<compile_context>
chip_gen: v7x
topology: tpu7x:2x2x1
jax: 0.10.0
libtpu: 0.0.40
codegen_flags: <defaults>
</compile_context>

<pallas_src>
import functools

import jax
import jax.numpy as jnp
from jax import lax
from jax.experimental import pallas as pl
from jax.experimental.pallas import tpu as pltpu


# ----------------------------- Pallas kernels ------------------------------

def _conv1_diff_kernel(px_ref, py_ref, w_ref, b_ref, d_ref):
    """relu(px@w + b) - relu(py@w + b) for one M-tile (conv1 on both branches)."""
    w = w_ref[...]
    b = b_ref[...]                                   # (1, Cmid) f32
    h1 = jnp.dot(px_ref[...], w, preferred_element_type=jnp.float32) + b
    h2 = jnp.dot(py_ref[...], w, preferred_element_type=jnp.float32) + b
    d = jnp.maximum(h1, 0.0) - jnp.maximum(h2, 0.0)
    d_ref[...] = d.astype(d_ref.dtype)


def _conv2_l1_kernel(dpad_ref, w_ref, mask_ref, loss_ref, *, wpad, hw2, cmid):
    """3x3 conv of the padded difference image of one batch element, done as 9
    shifted-slab matmuls in VMEM, + masked L1 partial sum accumulated across
    the batch grid in the resident SMEM output (b2 cancels, so no bias)."""
    i = pl.program_id(0)

    @pl.when(i == 0)
    def _():
        loss_ref[0, 0] = 0.0

    cout = w_ref.shape[1]
    acc = jnp.zeros((hw2, cout), jnp.float32)
    for tap in range(9):                             # static unroll: 9 taps
        dy, dx = tap // 3, tap % 3
        off = dy * wpad + dx
        patch = dpad_ref[pl.ds(off, hw2), :]         # (hw2, Cmid) bf16
        wk = w_ref[pl.ds(tap * cmid, cmid), :]       # (Cmid, Cout) bf16
        acc = acc + jnp.dot(patch, wk, preferred_element_type=jnp.float32)

    # mask zeroes the width-padding columns and carries the 1/(N*H*W*Cout) scale
    loss_ref[0, 0] += jnp.sum(jnp.abs(acc) * mask_ref[...])


# ------------------------------ JAX glue ----------------------------------

def _im2col3x3(x_nhwc):
    """(N,H,W,C) -> (N*H*W, 9*C) patches for a 3x3, stride-1, pad-1 conv."""
    n, h, w, c = x_nhwc.shape
    xp = jnp.pad(x_nhwc, ((0, 0), (1, 1), (1, 1), (0, 0)))
    cols = []
    for dy in range(3):
        for dx in range(3):
            cols.append(xp[:, dy:dy + h, dx:dx + w, :])
    return jnp.concatenate(cols, axis=-1).reshape(n * h * w, 9 * c)


def _weight_to_matmul(w_oihw):
    """PyTorch (Cout,Cin,3,3) -> (9*Cin, Cout) matching im2col / tap order."""
    cout = w_oihw.shape[0]
    return jnp.transpose(w_oihw, (2, 3, 1, 0)).reshape(-1, cout)


def perceptual_loss(x_nchw, y_nchw, w1, b1, w2, b2, *, tm=256):
    """Pallas equivalent of perceptualloss.forward(x, y). Returns a scalar."""
    n, cin, h, w = x_nchw.shape
    cmid = w1.shape[0]
    cout = w2.shape[0]

    x_nhwc = jnp.transpose(x_nchw, (0, 2, 3, 1)).astype(jnp.bfloat16)
    y_nhwc = jnp.transpose(y_nchw, (0, 2, 3, 1)).astype(jnp.bfloat16)

    # ---- stage 1: conv1 + ReLU on both branches, output d = h1 - h2 --------
    k1 = 9 * cin
    k1p = ((k1 + 7) // 8) * 8                        # pad reduction dim 27 -> 32
    m = n * h * w
    m8 = ((m + 7) // 8) * 8
    tm = min(tm, m8)
    mpad = pl.cdiv(m8, tm) * tm

    px = jnp.pad(_im2col3x3(x_nhwc), ((0, mpad - m), (0, k1p - k1)))
    py = jnp.pad(_im2col3x3(y_nhwc), ((0, mpad - m), (0, k1p - k1)))
    w1_2d = jnp.pad(_weight_to_matmul(w1),
                    ((0, k1p - k1), (0, 0))).astype(jnp.bfloat16)   # (32, Cmid)
    b1_row = b1.reshape(1, cmid).astype(jnp.float32)

    d = pl.pallas_call(
        _conv1_diff_kernel,
        grid=(mpad // tm,),
        out_shape=jax.ShapeDtypeStruct((mpad, cmid), jnp.bfloat16),
        in_specs=[
            pl.BlockSpec((tm, k1p), lambda i: (i, 0)),
            pl.BlockSpec((tm, k1p), lambda i: (i, 0)),
            pl.BlockSpec((k1p, cmid), lambda i: (0, 0)),
            pl.BlockSpec((1, cmid), lambda i: (0, 0)),
        ],
        out_specs=pl.BlockSpec((tm, cmid), lambda i: (i, 0)),
        compiler_params=pltpu.CompilerParams(
            dimension_semantics=("parallel",),
            vmem_limit_bytes=32 * 1024 * 1024),
    )(px, py, w1_2d, b1_row)

    # ---- stage 2: conv2 of the difference + fused L1 mean ------------------
    wpad = w + 2                                     # padded width
    hw2 = h * wpad                                   # rows of conv output slab
    p_rows = (h + 3) * wpad                          # (1 top + 2 bottom) H pad
    d_img = d[:m].reshape(n, h, w, cmid)
    d_pad = jnp.pad(d_img, ((0, 0), (1, 2), (1, 1), (0, 0)))
    d_flat = d_pad.reshape(n, p_rows, cmid)          # (N, P, Cmid) bf16

    col = jnp.arange(hw2, dtype=jnp.int32) % wpad
    mask = (col < w).astype(jnp.float32) * (1.0 / (n * h * w * cout))
    mask = mask.reshape(hw2, 1)

    w2_2d = _weight_to_matmul(w2).astype(jnp.bfloat16)   # (9*Cmid, Cout); b2 cancels

    loss = pl.pallas_call(
        functools.partial(_conv2_l1_kernel, wpad=wpad, hw2=hw2, cmid=cmid),
        grid=(n,),
        out_shape=jax.ShapeDtypeStruct((1, 1), jnp.float32),
        in_specs=[
            pl.BlockSpec((None, p_rows, cmid), lambda i: (i, 0, 0)),
            pl.BlockSpec((9 * cmid, cout), lambda i: (0, 0)),
            pl.BlockSpec((hw2, 1), lambda i: (0, 0)),
        ],
        out_specs=pl.BlockSpec(memory_space=pltpu.MemorySpace.SMEM),
        compiler_params=pltpu.CompilerParams(
            dimension_semantics=("arbitrary",),
            vmem_limit_bytes=32 * 1024 * 1024),
    )(d_flat, w2_2d, mask)
    return loss[0, 0]


# ------------------------- pure-JAX reference ------------------------------

def _reference_loss(x, y, w1, b1, w2, b2):
    def feat(img):
        o = lax.conv_general_dilated(
            img, w1, (1, 1), "SAME",
            dimension_numbers=("NCHW", "OIHW", "NCHW")) + b1[None, :, None, None]
        o = jnp.maximum(o, 0.0)
        o = lax.conv_general_dilated(
            o, w2, (1, 1), "SAME",
            dimension_numbers=("NCHW", "OIHW", "NCHW")) + b2[None, :, None, None]
        return o
    return jnp.mean(jnp.abs(feat(x) - feat(y)))


# --------------------------------- main ------------------------------------

if __name__ == "__main__":
    key = jax.random.PRNGKey(0)
    k1, k2, k3, k4, k5, k6 = jax.random.split(key, 6)

    # Deterministic synthetic VGG16 features[0:3] parameters (not a checkpoint).
    w1 = jax.random.normal(k1, (64, 3, 3, 3), jnp.float32) * 0.1    # Conv2d(3, 64, 3, pad=1)
    b1 = jax.random.normal(k2, (64,), jnp.float32) * 0.1
    w2 = jax.random.normal(k3, (64, 64, 3, 3), jnp.float32) * 0.05  # Conv2d(64, 64, 3, pad=1)
    b2 = jax.random.normal(k4, (64,), jnp.float32) * 0.1

    # Inputs: NCHW, 3 channels (VGG expects RGB), small spatial size.
    x = jax.random.normal(k5, (2, 3, 16, 16), jnp.float32)
    y = jax.random.normal(k6, (2, 3, 16, 16), jnp.float32)

    loss = jax.block_until_ready(jax.jit(perceptual_loss)(x, y, w1, b1, w2, b2))
    ref = jax.block_until_ready(_reference_loss(x, y, w1, b1, w2, b2))

    if not jnp.allclose(loss, ref, rtol=3e-2, atol=2e-3):
        raise AssertionError(f"mismatch: pallas={float(loss)} ref={float(ref)}")

    print("KERNEL_OK")
</pallas_src>

<mosaic_0001>
module attributes {stable_mosaic.version = 11 : i64} {
  func.func @_conv1_diff_kernel(%arg0: i32, %arg1: memref<256x32xbf16, #tpu.memory_space<vmem>>, %arg2: memref<256x32xbf16, #tpu.memory_space<vmem>>, %arg3: memref<32x64xbf16, #tpu.memory_space<vmem>>, %arg4: memref<1x64xf32, #tpu.memory_space<vmem>>, %arg5: memref<256x64xbf16, #tpu.memory_space<vmem>>) attributes {dimension_semantics = [#tpu.dimension_semantics<parallel>], iteration_bounds = array<i64: 2>, scalar_prefetch = 0 : i64, scratch_operands = 0 : i64, tpu.core_type = #tpu.core_type<tc>, window_params = [{transform_indices = @transform_0, window_bounds = array<i64: 256, 32>}, {transform_indices = @transform_1, window_bounds = array<i64: 256, 32>}, {pipeline_mode = #tpu.pipeline_mode<synchronous>, transform_indices = @transform_2, window_bounds = array<i64: 32, 64>}, {pipeline_mode = #tpu.pipeline_mode<synchronous>, transform_indices = @transform_3, window_bounds = array<i64: 1, 64>}, {transform_indices = @transform_4, window_bounds = array<i64: 256, 64>}]} {
    %c0 = arith.constant 0 : index
    %c0_0 = arith.constant 0 : index
    %0 = vector.load %arg3[%c0, %c0_0] : memref<32x64xbf16, #tpu.memory_space<vmem>>, vector<32x64xbf16>
    %c0_1 = arith.constant 0 : index
    %c0_2 = arith.constant 0 : index
    %1 = vector.load %arg4[%c0_1, %c0_2] : memref<1x64xf32, #tpu.memory_space<vmem>>, vector<1x64xf32>
    %c0_3 = arith.constant 0 : index
    %c0_4 = arith.constant 0 : index
    %2 = vector.load %arg1[%c0_3, %c0_4] : memref<256x32xbf16, #tpu.memory_space<vmem>>, vector<256x32xbf16>
    %cst = arith.constant dense<0.000000e+00> : vector<256x64xf32>
    %3 = tpu.matmul %2, %0, %cst {dimension_numbers = #tpu.dot_dimension_numbers<[1], [0], [0], [1], [0, 0, 1, 1], [], []>} : vector<256x32xbf16>, vector<32x64xbf16>, vector<256x64xf32> -> vector<256x64xf32>
    %4 = vector.broadcast %1 : vector<1x64xf32> to vector<256x64xf32>
    %5 = arith.addf %3, %4 : vector<256x64xf32>
    %c0_5 = arith.constant 0 : index
    %c0_6 = arith.constant 0 : index
    %6 = vector.load %arg2[%c0_5, %c0_6] : memref<256x32xbf16, #tpu.memory_space<vmem>>, vector<256x32xbf16>
    %cst_7 = arith.constant dense<0.000000e+00> : vector<256x64xf32>
    %7 = tpu.matmul %6, %0, %cst_7 {dimension_numbers = #tpu.dot_dimension_numbers<[1], [0], [0], [1], [0, 0, 1, 1], [], []>} : vector<256x32xbf16>, vector<32x64xbf16>, vector<256x64xf32> -> vector<256x64xf32>
    %8 = vector.broadcast %1 : vector<1x64xf32> to vector<256x64xf32>
    %9 = arith.addf %7, %8 : vector<256x64xf32>
    %cst_8 = arith.constant 0.000000e+00 : f32
    %10 = vector.broadcast %cst_8 : f32 to vector<256x64xf32>
    %11 = arith.maximumf %5, %10 : vector<256x64xf32>
    %cst_9 = arith.constant 0.000000e+00 : f32
    %12 = vector.broadcast %cst_9 : f32 to vector<256x64xf32>
    %13 = arith.maximumf %9, %12 : vector<256x64xf32>
    %14 = arith.subf %11, %13 : vector<256x64xf32>
    %15 = arith.truncf %14 : vector<256x64xf32> to vector<256x64xbf16>
    %c0_10 = arith.constant 0 : index
    %c0_11 = arith.constant 0 : index
    %16 = vector.load %arg5[%c0_10, %c0_11] : memref<256x64xbf16, #tpu.memory_space<vmem>>, vector<256x64xbf16>
    tpu.vector_store %arg5[%c0_10, %c0_11], %15 {strides = array<i32>} : memref<256x64xbf16, #tpu.memory_space<vmem>>, vector<256x64xbf16>,
    return
  }
  func.func @transform_0(%arg0: i32) -> (i32, i32) {
    %c0_i32 = arith.constant 0 : i32
    %c0_i32_0 = arith.constant 0 : i32
    return %arg0, %c0_i32 : i32, i32
  }
  func.func @transform_1(%arg0: i32) -> (i32, i32) {
    %c0_i32 = arith.constant 0 : i32
    %c0_i32_0 = arith.constant 0 : i32
    return %arg0, %c0_i32 : i32, i32
  }
  func.func @transform_2(%arg0: i32) -> (i32, i32) {
    %c0_i32 = arith.constant 0 : i32
    %c0_i32_0 = arith.constant 0 : i32
    %c0_i32_1 = arith.constant 0 : i32
    return %c0_i32, %c0_i32_0 : i32, i32
  }
  func.func @transform_3(%arg0: i32) -> (i32, i32) {
    %c0_i32 = arith.constant 0 : i32
    %c0_i32_0 = arith.constant 0 : i32
    %c0_i32_1 = arith.constant 0 : i32
    return %c0_i32, %c0_i32_0 : i32, i32
  }
  func.func @transform_4(%arg0: i32) -> (i32, i32) {
    %c0_i32 = arith.constant 0 : i32
    %c0_i32_0 = arith.constant 0 : i32
    return %arg0, %c0_i32 : i32, i32
  }
}

module attributes {stable_mosaic.version = 11 : i64} {
  func.func @_conv2_l1_kernel(%arg0: i32, %arg1: memref<1x342x64xbf16, #tpu.memory_space<vmem>>, %arg2: memref<576x64xbf16, #tpu.memory_space<vmem>>, %arg3: memref<288x1xf32, #tpu.memory_space<vmem>>, %arg4: memref<1x1xf32, #tpu.memory_space<smem>>) attributes {dimension_semantics = [#tpu.dimension_semantics<arbitrary>], iteration_bounds = array<i64: 2>, scalar_prefetch = 0 : i64, scratch_operands = 0 : i64, tpu.core_type = #tpu.core_type<tc>, window_params = [{transform_indices = @transform_0, window_bounds = array<i64: 1, 342, 64>}, {pipeline_mode = #tpu.pipeline_mode<synchronous>, transform_indices = @transform_1, window_bounds = array<i64: 576, 64>}, {pipeline_mode = #tpu.pipeline_mode<synchronous>, transform_indices = @transform_2, window_bounds = array<i64: 288, 1>}, {transform_indices = @transform_3, window_bounds = array<i64: 1, 1>}]} {
    %c0_i32 = arith.constant 0 : i32
    %0 = arith.cmpi eq, %arg0, %c0_i32 : i32
    %1 = arith.extui %0 : i1 to i32
    %c0_i32_0 = arith.constant 0 : i32
    %2 = arith.cmpi ne, %1, %c0_i32_0 : i32
    scf.if %2 {
      %cst_45 = arith.constant 0.000000e+00 : f32
      %c0_46 = arith.constant 0 : index
      %c0_47 = arith.constant 0 : index
      %60 = memref.load %arg4[%c0_46, %c0_47] : memref<1x1xf32, #tpu.memory_space<smem>>
      memref.store %cst_45, %arg4[%c0_46, %c0_47] : memref<1x1xf32, #tpu.memory_space<smem>>
    } else {
    }
    %cst = arith.constant 0.000000e+00 : f32
    %3 = vector.broadcast %cst : f32 to vector<288x64xf32>
    %c0 = arith.constant 0 : index
    %c0_1 = arith.constant 0 : index
    %c0_2 = arith.constant 0 : index
    %4 = vector.load %arg1[%c0, %c0_1, %c0_2] : memref<1x342x64xbf16, #tpu.memory_space<vmem>>, vector<1x288x64xbf16>
    %5 = vector.shape_cast %4 : vector<1x288x64xbf16> to vector<288x64xbf16>
    %c0_3 = arith.constant 0 : index
    %c0_4 = arith.constant 0 : index
    %6 = vector.load %arg2[%c0_3, %c0_4] : memref<576x64xbf16, #tpu.memory_space<vmem>>, vector<64x64xbf16>
    %cst_5 = arith.constant dense<0.000000e+00> : vector<288x64xf32>
    %7 = tpu.matmul %5, %6, %cst_5 {dimension_numbers = #tpu.dot_dimension_numbers<[1], [0], [0], [1], [0, 0, 1, 1], [], []>} : vector<288x64xbf16>, vector<64x64xbf16>, vector<288x64xf32> -> vector<288x64xf32>
    %8 = arith.addf %3, %7 : vector<288x64xf32>
    %c0_6 = arith.constant 0 : index
    %c1 = arith.constant 1 : index
    %c0_7 = arith.constant 0 : index
    %9 = vector.load %arg1[%c0_6, %c1, %c0_7] : memref<1x342x64xbf16, #tpu.memory_space<vmem>>, vector<1x288x64xbf16>
    %10 = vector.shape_cast %9 : vector<1x288x64xbf16> to vector<288x64xbf16>
    %c64 = arith.constant 64 : index
    %c0_8 = arith.constant 0 : index
    %11 = vector.load %arg2[%c64, %c0_8] : memref<576x64xbf16, #tpu.memory_space<vmem>>, vector<64x64xbf16>
    %cst_9 = arith.constant dense<0.000000e+00> : vector<288x64xf32>
    %12 = tpu.matmul %10, %11, %cst_9 {dimension_numbers = #tpu.dot_dimension_numbers<[1], [0], [0], [1], [0, 0, 1, 1], [], []>} : vector<288x64xbf16>, vector<64x64xbf16>, vector<288x64xf32> -> vector<288x64xf32>
    %13 = arith.addf %8, %12 : vector<288x64xf32>
    %c0_10 = arith.constant 0 : index
    %c2 = arith.constant 2 : index
    %c0_11 = arith.constant 0 : index
    %14 = vector.load %arg1[%c0_10, %c2, %c0_11] : memref<1x342x64xbf16, #tpu.memory_space<vmem>>, vector<1x288x64xbf16>
    %15 = vector.shape_cast %14 : vector<1x288x64xbf16> to vector<288x64xbf16>
    %c128 = arith.constant 128 : index
    %c0_12 = arith.constant 0 : index
    %16 = vector.load %arg2[%c128, %c0_12] : memref<576x64xbf16, #tpu.memory_space<vmem>>, vector<64x64xbf16>
    %cst_13 = arith.constant dense<0.000000e+00> : vector<288x64xf32>
    %17 = tpu.matmul %15, %16, %cst_13 {dimension_numbers = #tpu.dot_dimension_numbers<[1], [0], [0], [1], [0, 0, 1, 1], [], []>} : vector<288x64xbf16>, vector<64x64xbf16>, vector<288x64xf32> -> vector<288x64xf32>
    %18 = arith.addf %13, %17 : vector<288x64xf32>
    %c0_14 = arith.constant 0 : index
    %c18 = arith.constant 18 : index
    %c0_15 = arith.constant 0 : index
    %19 = vector.load %arg1[%c0_14, %c18, %c0_15] : memref<1x342x64xbf16, #tpu.memory_space<vmem>>, vector<1x288x64xbf16>
    %20 = vector.shape_cast %19 : vector<1x288x64xbf16> to vector<288x64xbf16>
    %c192 = arith.constant 192 : index
    %c0_16 = arith.constant 0 : index
    %21 = vector.load %arg2[%c192, %c0_16] : memref<576x64xbf16, #tpu.memory_space<vmem>>, vector<64x64xbf16>
    %cst_17 = arith.constant dense<0.000000e+00> : vector<288x64xf32>
    %22 = tpu.matmul %20, %21, %cst_17 {dimension_numbers = #tpu.dot_dimension_numbers<[1], [0], [0], [1], [0, 0, 1, 1], [], []>} : vector<288x64xbf16>, vector<64x64xbf16>, vector<288x64xf32> -> vector<288x64xf32>
    %23 = arith.addf %18, %22 : vector<288x64xf32>
    %c0_18 = arith.constant 0 : index
    %c19 = arith.constant 19 : index
    %c0_19 = arith.constant 0 : index
    %24 = vector.load %arg1[%c0_18, %c19, %c0_19] : memref<1x342x64xbf16, #tpu.memory_space<vmem>>, vector<1x288x64xbf16>
    %25 = vector.shape_cast %24 : vector<1x288x64xbf16> to vector<288x64xbf16>
    %c256 = arith.constant 256 : index
    %c0_20 = arith.constant 0 : index
    %26 = vector.load %arg2[%c256, %c0_20] : memref<576x64xbf16, #tpu.memory_space<vmem>>, vector<64x64xbf16>
    %cst_21 = arith.constant dense<0.000000e+00> : vector<288x64xf32>
    %27 = tpu.matmul %25, %26, %cst_21 {dimension_numbers = #tpu.dot_dimension_numbers<[1], [0], [0], [1], [0, 0, 1, 1], [], []>} : vector<288x64xbf16>, vector<64x64xbf16>, vector<288x64xf32> -> vector<288x64xf32>
    %28 = arith.addf %23, %27 : vector<288x64xf32>
    %c0_22 = arith.constant 0 : index
    %c20 = arith.constant 20 : index
    %c0_23 = arith.constant 0 : index
    %29 = vector.load %arg1[%c0_22, %c20, %c0_23] : memref<1x342x64xbf16, #tpu.memory_space<vmem>>, vector<1x288x64xbf16>
    %30 = vector.shape_cast %29 : vector<1x288x64xbf16> to vector<288x64xbf16>
    %c320 = arith.constant 320 : index
    %c0_24 = arith.constant 0 : index
    %31 = vector.load %arg2[%c320, %c0_24] : memref<576x64xbf16, #tpu.memory_space<vmem>>, vector<64x64xbf16>
    %cst_25 = arith.constant dense<0.000000e+00> : vector<288x64xf32>
    %32 = tpu.matmul %30, %31, %cst_25 {dimension_numbers = #tpu.dot_dimension_numbers<[1], [0], [0], [1], [0, 0, 1, 1], [], []>} : vector<288x64xbf16>, vector<64x64xbf16>, vector<288x64xf32> -> vector<288x64xf32>
    %33 = arith.addf %28, %32 : vector<288x64xf32>
    %c0_26 = arith.constant 0 : index
    %c36 = arith.constant 36 : index
    %c0_27 = arith.constant 0 : index
    %34 = vector.load %arg1[%c0_26, %c36, %c0_27] : memref<1x342x64xbf16, #tpu.memory_space<vmem>>, vector<1x288x64xbf16>
    %35 = vector.shape_cast %34 : vector<1x288x64xbf16> to vector<288x64xbf16>
    %c384 = arith.constant 384 : index
    %c0_28 = arith.constant 0 : index
    %36 = vector.load %arg2[%c384, %c0_28] : memref<576x64xbf16, #tpu.memory_space<vmem>>, vector<64x64xbf16>
    %cst_29 = arith.constant dense<0.000000e+00> : vector<288x64xf32>
    %37 = tpu.matmul %35, %36, %cst_29 {dimension_numbers = #tpu.dot_dimension_numbers<[1], [0], [0], [1], [0, 0, 1, 1], [], []>} : vector<288x64xbf16>, vector<64x64xbf16>, vector<288x64xf32> -> vector<288x64xf32>
    %38 = arith.addf %33, %37 : vector<288x64xf32>
    %c0_30 = arith.constant 0 : index
    %c37 = arith.constant 37 : index
    %c0_31 = arith.constant 0 : index
    %39 = vector.load %arg1[%c0_30, %c37, %c0_31] : memref<1x342x64xbf16, #tpu.memory_space<vmem>>, vector<1x288x64xbf16>
    %40 = vector.shape_cast %39 : vector<1x288x64xbf16> to vector<288x64xbf16>
    %c448 = arith.constant 448 : index
    %c0_32 = arith.constant 0 : index
    %41 = vector.load %arg2[%c448, %c0_32] : memref<576x64xbf16, #tpu.memory_space<vmem>>, vector<64x64xbf16>
    %cst_33 = arith.constant dense<0.000000e+00> : vector<288x64xf32>
    %42 = tpu.matmul %40, %41, %cst_33 {dimension_numbers = #tpu.dot_dimension_numbers<[1], [0], [0], [1], [0, 0, 1, 1], [], []>} : vector<288x64xbf16>, vector<64x64xbf16>, vector<288x64xf32> -> vector<288x64xf32>
    %43 = arith.addf %38, %42 : vector<288x64xf32>
    %c0_34 = arith.constant 0 : index
    %c38 = arith.constant 38 : index
    %c0_35 = arith.constant 0 : index
    %44 = vector.load %arg1[%c0_34, %c38, %c0_35] : memref<1x342x64xbf16, #tpu.memory_space<vmem>>, vector<1x288x64xbf16>
    %45 = vector.shape_cast %44 : vector<1x288x64xbf16> to vector<288x64xbf16>
    %c512 = arith.constant 512 : index
    %c0_36 = arith.constant 0 : index
    %46 = vector.load %arg2[%c512, %c0_36] : memref<576x64xbf16, #tpu.memory_space<vmem>>, vector<64x64xbf16>
    %cst_37 = arith.constant dense<0.000000e+00> : vector<288x64xf32>
    %47 = tpu.matmul %45, %46, %cst_37 {dimension_numbers = #tpu.dot_dimension_numbers<[1], [0], [0], [1], [0, 0, 1, 1], [], []>} : vector<288x64xbf16>, vector<64x64xbf16>, vector<288x64xf32> -> vector<288x64xf32>
    %48 = arith.addf %43, %47 : vector<288x64xf32>
    %c0_38 = arith.constant 0 : index
    %c0_39 = arith.constant 0 : index
    %49 = memref.load %arg4[%c0_38, %c0_39] : memref<1x1xf32, #tpu.memory_space<smem>>
    %50 = math.absf %48 : vector<288x64xf32>
    %c0_40 = arith.constant 0 : index
    %c0_41 = arith.constant 0 : index
    %51 = vector.load %arg3[%c0_40, %c0_41] : memref<288x1xf32, #tpu.memory_space<vmem>>, vector<288x1xf32>
    %52 = vector.broadcast %51 : vector<288x1xf32> to vector<288x64xf32>
    %53 = arith.mulf %50, %52 : vector<288x64xf32>
    %54 = vector.shape_cast %53 : vector<288x64xf32> to vector<1x288x64xf32>
    %cst_42 = arith.constant dense<0.000000e+00> : vector<1xf32>
    %55 = vector.multi_reduction <add>, %54, %cst_42 [1, 2] : vector<1x288x64xf32> to vector<1xf32>
    %56 = vector.shape_cast %55 : vector<1xf32> to vector<1x1x1xf32>
    %57 = vector.extract %56[0, 0, 0] : f32 from vector<1x1x1xf32>
    %58 = arith.addf %49, %57 : f32
    %c0_43 = arith.constant 0 : index
    %c0_44 = arith.constant 0 : index
    %59 = memref.load %arg4[%c0_43, %c0_44] : memref<1x1xf32, #tpu.memory_space<smem>>
    memref.store %58, %arg4[%c0_43, %c0_44] : memref<1x1xf32, #tpu.memory_space<smem>>
    return
  }
  func.func @transform_0(%arg0: i32) -> (i32, i32, i32) {
    %c0_i32 = arith.constant 0 : i32
    %c0_i32_0 = arith.constant 0 : i32
    %c0_i32_1 = arith.constant 0 : i32
    return %arg0, %c0_i32, %c0_i32_0 : i32, i32, i32
  }
  func.func @transform_1(%arg0: i32) -> (i32, i32) {
    %c0_i32 = arith.constant 0 : i32
    %c0_i32_0 = arith.constant 0 : i32
    %c0_i32_1 = arith.constant 0 : i32
    return %c0_i32, %c0_i32_0 : i32, i32
  }
  func.func @transform_2(%arg0: i32) -> (i32, i32) {
    %c0_i32 = arith.constant 0 : i32
    %c0_i32_0 = arith.constant 0 : i32
    %c0_i32_1 = arith.constant 0 : i32
    return %c0_i32, %c0_i32_0 : i32, i32
  }
  func.func @transform_3(%arg0: i32) -> (i32, i32) {
    %c0_i32 = arith.constant 0 : i32
    %c0_i32_0 = arith.constant 0 : i32
    %c0_i32_1 = arith.constant 0 : i32
    return %c0_i32, %c0_i32_0 : i32, i32
  }
}

</mosaic_0001>

<bundles_post_ra>
// kernel: perceptual_loss.2
= control target key start
LH: loop header
LB: loop body
LE: loop exit
PB: predicated region body
PF: predicated region fallthrough
CT: control target
= control target key end

     0   :  { %s1542_s15 = smov 0   ;;  %s1776_s0 = inlined_call_operand.vmem [shape: bf16[512,32], index: 0, kind: input, shape index: {}]   ;;  %s1777_s1 = inlined_call_operand.vmem [shape: bf16[512,32], index: 1, kind: input, shape index: {}]   ;;  %s1778_s2 = inlined_call_operand.vmem [shape: bf16[32,64], index: 2, kind: input, shape index: {}]   ;;  %s1779_s3 = inlined_call_operand.vmem [shape: f32[1,64], index: 3, kind: input, shape index: {}]   ;;  %s1780_s4 = inlined_call_operand.vmem [shape: bf16[512,64], index: 4, kind: output, shape index: {}]  }
   0x1 LB: > { %s1215_s16 = sadd.s32 4294967295, %s1515_s15   ;;  %p1219_p0 = scmp.ge.s32.totalorder %s1515_s15, 1  ;;  %s1515_s15 = sphi %s1542_s15, %s14_s15  }
   0x2   : > { %p174_p1 = scmp.lt.s32.totalorder %s1515_s15, 3 }
   0x4   : > { %p175_p2 = pnand %p1219_p0, %p174_p1 }
   0x5   : > { %v1475_v0 = vld [vmem:[%s1778_s2] sm:$0xff] (!%p175_p2)   ;;  %s1220_s19 = sshll.u32 (!%p175_p2), %s1215_s16, 5  ;;  %v1476_v1 = vld [vmem:[%s1778_s2 + $0x8] sm:$0xff] (!%p175_p2)   ;;  %vm359_vm0 = vcmask (!%p175_p2), 261120   ;;  %vm1114_vm1 = vcmask (!%p175_p2), 519168  }
   0x6   : > { %178 = sbr.rel (%p175_p2) target bundleno = 299 (0x12b), region = 36  ;;  %p206_p3 = scmp.lt.s32.totalorder (!%p175_p2), %s1220_s19, 63  ;;  %1395 = vmatprep.subr.bf16.mxu0 (!%p175_p2), %v1475_v0  ;;  %1431 = vmatprep.subr.bf16.mxu1 (!%p175_p2), %v1475_v0  ;;  %v1637_v34 = vld [vmem:[%s1779_s3] ss:$0 sm:$0xff] (!%p175_p2) }
   0x7   : > { %1396 = vmatpush3.bf16.msra.mxu0 (!%p175_p2), %v1475_v0  ;;  %1432 = vmatpush3.bf16.msra.mxu1 (!%p175_p2), %v1475_v0 }
   0x8   : > { %1397 = vmatprep.subr.bf16.mxu0 (!%p175_p2), %v1476_v1  ;;  %1433 = vmatprep.subr.bf16.mxu1 (!%p175_p2), %v1476_v1 }
   0xb   : > { %1398 = vmatpush3.bf16.msra.mxu0 (!%p175_p2), %v1476_v1  ;;  %1434 = vmatpush3.bf16.msra.mxu1 (!%p175_p2), %v1476_v1 }
   0xd   : > { %s1782_s19 = smov (!%p206_p3, %s1220_s19), 63 }
   0xe   : > { %s1556_s22 = sshll.u32 %s1782_s19, 2 }
   0xf   : > { %s1562_s25 = scalar_lea.vmem %s1776_s0, %s1556_s22  ;;  %s1569_s28 = scalar_lea.vmem %s1777_s1, %s1556_s22 }
  0x10   : > { %v1477_v2 = vld [vmem:[%s1562_s25] sm:$0xff]   ;;  %v1479_v4 = vld [vmem:[%s1562_s25 + $0x8] sm:$0xff]   ;;  %v1481_v6 = vld [vmem:[%s1562_s25 + $0x10] sm:$0xff]   ;;  %s1651_s7 = scalar_lea.vmem %s1780_s4, %s1556_s22 }
  0x11   : > { %v1478_v3 = vld [vmem:[%s1569_s28] sm:$0xff]   ;;  %1399 = vmatprep.mubr.msk.bf16.mxu0 %vm359_vm0, %v1477_v2  ;;  %v1480_v5 = vld [vmem:[%s1569_s28 + $0x8] sm:$0xff]   ;;  %v1482_v7 = vld [vmem:[%s1569_s28 + $0x10] sm:$0xff]  }
  0x12   : > { %1435 = vmatprep.mubr.msk.bf16.mxu1 %vm359_vm0, %v1478_v3  ;;  %1400 = vmatmul.mubr.msk.bf16.vlgmr.msra.gmra.mrb[0].mxu0 %vm359_vm0, %v1479_v4  ;;  %v1483_v8 = vld [vmem:[%s1562_s25 + $0x18] sm:$0xff]   ;;  %v1485_v10 = vld [vmem:[%s1562_s25 + $0x20] sm:$0xff]   ;;  %v1487_v12 = vld [vmem:[%s1562_s25 + $0x28] sm:$0xff]  }
  0x13   : > { %1436 = vmatmul.mubr.msk.bf16.vlgmr.msra.gmra.mrb[0].mxu1 %vm359_vm0, %v1480_v5  ;;  %1403 = vmatprep.mubr.msk.bf16.mxu0 %vm359_vm0, %v1481_v6  ;;  %v1484_v9 = vld [vmem:[%s1569_s28 + $0x18] sm:$0xff]   ;;  %v1486_v11 = vld [vmem:[%s1569_s28 + $0x20] sm:$0xff]   ;;  %v1488_v13 = vld [vmem:[%s1569_s28 + $0x28] sm:$0xff]  }
  0x14   : > { %1439 = vmatprep.mubr.msk.bf16.mxu1 %vm359_vm0, %v1482_v7  ;;  %v1489_v14 = vld [vmem:[%s1562_s25 + $0x30] sm:$0xff]   ;;  %v1491_v16 = vld [vmem:[%s1562_s25 + $0x38] sm:$0xff]   ;;  %v1493_v18 = vld [vmem:[%s1562_s25 + $0x40] sm:$0xff]  }
  0x15   : > { %v1490_v15 = vld [vmem:[%s1569_s28 + $0x30] sm:$0xff]   ;;  %v1492_v17 = vld [vmem:[%s1569_s28 + $0x38] sm:$0xff]   ;;  %v1494_v19 = vld [vmem:[%s1569_s28 + $0x40] sm:$0xff]  }
  0x16   : > { %v1495_v20 = vld [vmem:[%s1562_s25 + $0x48] sm:$0xff]   ;;  %v1497_v22 = vld [vmem:[%s1562_s25 + $0x50] sm:$0xff]   ;;  %v1499_v24 = vld [vmem:[%s1562_s25 + $0x58] sm:$0xff]  }
  0x17   : > { %v1496_v21 = vld [vmem:[%s1569_s28 + $0x48] sm:$0xff]   ;;  %v1498_v23 = vld [vmem:[%s1569_s28 + $0x50] sm:$0xff]   ;;  %v1500_v25 = vld [vmem:[%s1569_s28 + $0x58] sm:$0xff]  }
  0x18   : > { %v1501_v26 = vld [vmem:[%s1562_s25 + $0x60] sm:$0xff]   ;;  %v1503_v28 = vld [vmem:[%s1562_s25 + $0x68] sm:$0xff]   ;;  %v1505_v30 = vld [vmem:[%s1562_s25 + $0x70] sm:$0xff]  }
  0x19   : > { %v1502_v27 = vld [vmem:[%s1569_s28 + $0x60] sm:$0xff]   ;;  %v1504_v29 = vld [vmem:[%s1569_s28 + $0x68] sm:$0xff]   ;;  %v1506_v31 = vld [vmem:[%s1569_s28 + $0x70] sm:$0xff]  }
  0x1a   : > { %1404 = vmatmul.mubr.msk.bf16.gmra.mrb[4].mxu0 %vm359_vm0, %v1483_v8  ;;  %v1507_v32 = vld [vmem:[%s1562_s25 + $0x78] sm:$0xff]  }
  0x1b   : > { %1440 = vmatmul.mubr.msk.bf16.gmra.mrb[4].mxu1 %vm359_vm0, %v1484_v9  ;;  %1407 = vmatprep.mubr.msk.bf16.mxu0 %vm359_vm0, %v1485_v10  ;;  %v1508_v33 = vld [vmem:[%s1569_s28 + $0x78] sm:$0xff]  }
  0x1c   : > { %1443 = vmatprep.mubr.msk.bf16.mxu1 %vm359_vm0, %v1486_v11 }
  0x22   : > { %1408 = vmatmul.mubr.msk.bf16.gmra.mrb[8].mxu0 %vm359_vm0, %v1487_v12 }
  0x23   : > { %1444 = vmatmul.mubr.msk.bf16.gmra.mrb[8].mxu1 %vm359_vm0, %v1488_v13  ;;  %1411 = vmatprep.mubr.msk.bf16.mxu0 %vm359_vm0, %v1489_v14 }
  0x24   : > { %1447 = vmatprep.mubr.msk.bf16.mxu1 %vm359_vm0, %v1490_v15 }
  0x2a   : > { %1412 = vmatmul.mubr.msk.bf16.gmra.mrb[12].mxu0 %vm359_vm0, %v1491_v16 }
  0x2b   : > { %1448 = vmatmul.mubr.msk.bf16.gmra.mrb[12].mxu1 %vm359_vm0, %v1492_v17  ;;  %1415 = vmatprep.mubr.msk.bf16.mxu0 %vm359_vm0, %v1493_v18 }
  0x2c   : > { %1451 = vmatprep.mubr.msk.bf16.mxu1 %vm359_vm0, %v1494_v19 }
  0x32   : > { %1416 = vmatmul.mubr.msk.bf16.gmra.mrb[16].mxu0 %vm359_vm0, %v1495_v20 }
  0x33   : > { %1452 = vmatmul.mubr.msk.bf16.gmra.mrb[16].mxu1 %vm359_vm0, %v1496_v21  ;;  %1419 = vmatprep.mubr.msk.bf16.mxu0 %vm359_vm0, %v1497_v22 }
  0x34   : > { %1455 = vmatprep.mubr.msk.bf16.mxu1 %vm359_vm0, %v1498_v23 }
  0x3a   : > { %1420 = vmatmul.mubr.msk.bf16.gmra.mrb[20].mxu0 %vm359_vm0, %v1499_v24 }
  0x3b   : > { %1456 = vmatmul.mubr.msk.bf16.gmra.mrb[20].mxu1 %vm359_vm0, %v1500_v25  ;;  %1423 = vmatprep.mubr.msk.bf16.mxu0 %vm359_vm0, %v1501_v26 }
  0x3c   : > { %1459 = vmatprep.mubr.msk.bf16.mxu1 %vm359_vm0, %v1502_v27 }
  0x42   : > { %1424 = vmatmul.mubr.msk.bf16.gmra.mrb[24].mxu0 %vm359_vm0, %v1503_v28 }
  0x43   : > { %1460 = vmatmul.mubr.msk.bf16.gmra.mrb[24].mxu1 %vm359_vm0, %v1504_v29  ;;  %1427 = vmatprep.mubr.msk.bf16.mxu0 %vm359_vm0, %v1505_v30 }
  0x44   : > { %1463 = vmatprep.mubr.msk.bf16.mxu1 %vm359_vm0, %v1506_v31 }
  0x4a   : > { %1428 = vmatmul.mubr.msk.bf16.gmra.mrb[28].mxu0 %vm359_vm0, %v1507_v32 }
  0x4b   : > { %1464 = vmatmul.mubr.msk.bf16.gmra.mrb[28].mxu1 %vm359_vm0, %v1508_v33 }
  0xe5   : > { %v1401_v35 = vpop.f32.mrb[0].mxu0 }
  0xe6   : > { %v451_v36 = vadd.f32 %v1401_v35, %v1637_v34  ;;  %v1437_v37 = vpop.f32.mrb[0].mxu1  ;;  %v442_v38 = vpop.f32.mrb[1].mxu0 }
  0xe7   : > { %v772_v39 = vadd.f32 %v1437_v37, %v1637_v34  ;;  %v443_v40 = vadd.f32 %v1637_v34, %v442_v38  ;;  %v763_v41 = vpop.f32.mrb[1].mxu1  ;;  %v1402_v42 = vpop.f32.mrb[2].mxu0 }
  0xe8   : > { %v892_v43 = vmax.f32 %v451_v36, 0.0  ;;  %v764_v44 = vadd.f32 %v1637_v34, %v763_v41  ;;  %v454_v45 = vadd.f32 %v1402_v42, %v1637_v34  ;;  %v1438_v46 = vpop.f32.mrb[2].mxu1  ;;  %v445_v47 = vpop.f32.mrb[3].mxu0 }
  0xe9   : > { %v924_v48 = vmax.f32 %v772_v39, 0.0  ;;  %v890_v49 = vmax.f32 %v443_v40, 0.0  ;;  %v775_v50 = vadd.f32 %v1438_v46, %v1637_v34  ;;  %v446_v51 = vadd.f32 %v1637_v34, %v445_v47  ;;  %v766_v52 = vpop.f32.mrb[3].mxu1 }
  0xea   : > { %v922_v53 = vmax.f32 %v764_v44, 0.0  ;;  %v893_v54 = vmax.f32 %v454_v45, 0.0  ;;  %v767_v55 = vadd.f32 %v1637_v34, %v766_v52 }
  0xeb   : > { %v956_v56 = vsub.f32 %v892_v43, %v924_v48  ;;  %v925_v57 = vmax.f32 %v775_v50, 0.0  ;;  %v891_v58 = vmax.f32 %v446_v51, 0.0 }
  0xec   : > { %v954_v59 = vsub.f32 %v890_v49, %v922_v53  ;;  %v923_v60 = vmax.f32 %v767_v55, 0.0 }
  0xed   : > { %v1329_v61 = vpack.c.bf16 %v956_v56, %v956_v56  ;;  %v957_v62 = vsub.f32 %v893_v54, %v925_v57  ;;  %v1405_v63 = vpop.f32.mrb[4].mxu0 }
  0xee   : > { %v1327_v0 = vpack.c.bf16 %v954_v59, %v954_v59  ;;  %v955_v1 = vsub.f32 %v891_v58, %v923_v60  ;;  %v467_v2 = vadd.f32 %v1405_v63, %v1637_v34  ;;  %v1441_v3 = vpop.f32.mrb[4].mxu1  ;;  %v458_v4 = vpop.f32.mrb[5].mxu0 }
  0xef   : > { %1117 = vst.msk [vmem:[%s1651_s7 + $0x8] sm:$0xf] %vm1114_vm1, %v1329_v61  ;;  %v1330_v5 = vpack.c.bf16 %v957_v62, %v957_v62  ;;  %v788_v6 = vadd.f32 %v1441_v3, %v1637_v34  ;;  %v459_v7 = vadd.f32 %v1637_v34, %v458_v4  ;;  %v779_v8 = vpop.f32.mrb[5].mxu1  ;;  %v1406_v9 = vpop.f32.mrb[6].mxu0 }
  0xf0   : > { %1115 = vst.msk [vmem:[%s1651_s7] sm:$0xf] %vm1114_vm1, %v1327_v0  ;;  %v1328_v10 = vpack.c.bf16 %v955_v1, %v955_v1  ;;  %v896_v11 = vmax.f32 %v467_v2, 0.0  ;;  %v780_v12 = vadd.f32 %v1637_v34, %v779_v8  ;;  %v470_v13 = vadd.f32 %v1406_v9, %v1637_v34  ;;  %v1442_v14 = vpop.f32.mrb[6].mxu1  ;;  %v461_v15 = vpop.f32.mrb[7].mxu0 }
  0xf1   : > { %1118 = vst.msk [vmem:[%s1651_s7 + $0xc] sm:$0xf] %vm1114_vm1, %v1330_v5  ;;  %v928_v16 = vmax.f32 %v788_v6, 0.0  ;;  %v894_v17 = vmax.f32 %v459_v7, 0.0  ;;  %v791_v18 = vadd.f32 %v1442_v14, %v1637_v34  ;;  %v462_v19 = vadd.f32 %v1637_v34, %v461_v15  ;;  %v782_v20 = vpop.f32.mrb[7].mxu1 }
  0xf2   : > { %1116 = vst.msk [vmem:[%s1651_s7 + $0x4] sm:$0xf] %vm1114_vm1, %v1328_v10  ;;  %v926_v21 = vmax.f32 %v780_v12, 0.0  ;;  %v897_v22 = vmax.f32 %v470_v13, 0.0  ;;  %v783_v23 = vadd.f32 %v1637_v34, %v782_v20 }
  0xf3   : > { %v960_v24 = vsub.f32 %v896_v11, %v928_v16  ;;  %v929_v25 = vmax.f32 %v791_v18, 0.0  ;;  %v895_v26 = vmax.f32 %v462_v19, 0.0 }
  0xf4   : > { %v958_v27 = vsub.f32 %v894_v17, %v926_v21  ;;  %v927_v28 = vmax.f32 %v783_v23, 0.0 }
  0xf5   : > { %v1333_v29 = vpack.c.bf16 %v960_v24, %v960_v24  ;;  %v961_v30 = vsub.f32 %v897_v22, %v929_v25  ;;  %v1409_v31 = vpop.f32.mrb[8].mxu0 }
  0xf6   : > { %v1331_v32 = vpack.c.bf16 %v958_v27, %v958_v27  ;;  %v959_v33 = vsub.f32 %v895_v26, %v927_v28  ;;  %v483_v35 = vadd.f32 %v1409_v31, %v1637_v34  ;;  %v1445_v36 = vpop.f32.mrb[8].mxu1  ;;  %v474_v37 = vpop.f32.mrb[9].mxu0 }
  0xf7   : > { %1121 = vst.msk [vmem:[%s1651_s7 + $0x18] sm:$0xf] %vm1114_vm1, %v1333_v29  ;;  %v1334_v38 = vpack.c.bf16 %v961_v30, %v961_v30  ;;  %v804_v39 = vadd.f32 %v1445_v36, %v1637_v34  ;;  %v475_v40 = vadd.f32 %v1637_v34, %v474_v37  ;;  %v795_v41 = vpop.f32.mrb[9].mxu1  ;;  %v1410_v42 = vpop.f32.mrb[10].mxu0 }
  0xf8   : > { %1119 = vst.msk [vmem:[%s1651_s7 + $0x10] sm:$0xf] %vm1114_vm1, %v1331_v32  ;;  %v1332_v43 = vpack.c.bf16 %v959_v33, %v959_v33  ;;  %v900_v44 = vmax.f32 %v483_v35, 0.0  ;;  %v796_v45 = vadd.f32 %v1637_v34, %v795_v41  ;;  %v486_v46 = vadd.f32 %v1410_v42, %v1637_v34  ;;  %v1446_v47 = vpop.f32.mrb[10].mxu1  ;;  %v477_v48 = vpop.f32.mrb[11].mxu0 }
  0xf9   : > { %1122 = vst.msk [vmem:[%s1651_s7 + $0x1c] sm:$0xf] %vm1114_vm1, %v1334_v38  ;;  %v932_v49 = vmax.f32 %v804_v39, 0.0  ;;  %v898_v50 = vmax.f32 %v475_v40, 0.0  ;;  %v807_v51 = vadd.f32 %v1446_v47, %v1637_v34  ;;  %v478_v52 = vadd.f32 %v1637_v34, %v477_v48  ;;  %v798_v53 = vpop.f32.mrb[11].mxu1 }
  0xfa   : > { %1120 = vst.msk [vmem:[%s1651_s7 + $0x14] sm:$0xf] %vm1114_vm1, %v1332_v43  ;;  %v930_v54 = vmax.f32 %v796_v45, 0.0  ;;  %v901_v55 = vmax.f32 %v486_v46, 0.0  ;;  %v799_v56 = vadd.f32 %v1637_v34, %v798_v53 }
  0xfb   : > { %v964_v57 = vsub.f32 %v900_v44, %v932_v49  ;;  %v933_v58 = vmax.f32 %v807_v51, 0.0  ;;  %v899_v59 = vmax.f32 %v478_v52, 0.0 }
  0xfc   : > { %v962_v60 = vsub.f32 %v898_v50, %v930_v54  ;;  %v931_v61 = vmax.f32 %v799_v56, 0.0 }
  0xfd   : > { %v1337_v62 = vpack.c.bf16 %v964_v57, %v964_v57  ;;  %v965_v63 = vsub.f32 %v901_v55, %v933_v58  ;;  %v1413_v0 = vpop.f32.mrb[12].mxu0 }
  0xfe   : > { %v1335_v1 = vpack.c.bf16 %v962_v60, %v962_v60  ;;  %v963_v2 = vsub.f32 %v899_v59, %v931_v61  ;;  %v499_v3 = vadd.f32 %v1413_v0, %v1637_v34  ;;  %v1449_v4 = vpop.f32.mrb[12].mxu1  ;;  %v490_v5 = vpop.f32.mrb[13].mxu0 }
  0xff   : > { %1125 = vst.msk [vmem:[%s1651_s7 + $0x28] sm:$0xf] %vm1114_vm1, %v1337_v62  ;;  %v1338_v6 = vpack.c.bf16 %v965_v63, %v965_v63  ;;  %v820_v7 = vadd.f32 %v1449_v4, %v1637_v34  ;;  %v491_v8 = vadd.f32 %v1637_v34, %v490_v5  ;;  %v811_v9 = vpop.f32.mrb[13].mxu1  ;;  %v1414_v10 = vpop.f32.mrb[14].mxu0 }
 0x100   : > { %1123 = vst.msk [vmem:[%s1651_s7 + $0x20] sm:$0xf] %vm1114_vm1, %v1335_v1  ;;  %v1336_v11 = vpack.c.bf16 %v963_v2, %v963_v2  ;;  %v904_v12 = vmax.f32 %v499_v3, 0.0  ;;  %v812_v13 = vadd.f32 %v1637_v34, %v811_v9  ;;  %v502_v14 = vadd.f32 %v1414_v10, %v1637_v34  ;;  %v1450_v15 = vpop.f32.mrb[14].mxu1  ;;  %v493_v16 = vpop.f32.mrb[15].mxu0 }
 0x101   : > { %1126 = vst.msk [vmem:[%s1651_s7 + $0x2c] sm:$0xf] %vm1114_vm1, %v1338_v6  ;;  %v936_v17 = vmax.f32 %v820_v7, 0.0  ;;  %v902_v18 = vmax.f32 %v491_v8, 0.0  ;;  %v823_v19 = vadd.f32 %v1450_v15, %v1637_v34  ;;  %v494_v20 = vadd.f32 %v1637_v34, %v493_v16  ;;  %v814_v21 = vpop.f32.mrb[15].mxu1 }
 0x102   : > { %1124 = vst.msk [vmem:[%s1651_s7 + $0x24] sm:$0xf] %vm1114_vm1, %v1336_v11  ;;  %v934_v22 = vmax.f32 %v812_v13, 0.0  ;;  %v905_v23 = vmax.f32 %v502_v14, 0.0  ;;  %v815_v24 = vadd.f32 %v1637_v34, %v814_v21 }
 0x103   : > { %v968_v25 = vsub.f32 %v904_v12, %v936_v17  ;;  %v937_v26 = vmax.f32 %v823_v19, 0.0  ;;  %v903_v27 = vmax.f32 %v494_v20, 0.0 }
 0x104   : > { %v966_v28 = vsub.f32 %v902_v18, %v934_v22  ;;  %v935_v29 = vmax.f32 %v815_v24, 0.0 }
 0x105   : > { %v1341_v30 = vpack.c.bf16 %v968_v25, %v968_v25  ;;  %v969_v31 = vsub.f32 %v905_v23, %v937_v26  ;;  %v1417_v32 = vpop.f32.mrb[16].mxu0 }
 0x106   : > { %v1339_v33 = vpack.c.bf16 %v966_v28, %v966_v28  ;;  %v967_v35 = vsub.f32 %v903_v27, %v935_v29  ;;  %v515_v36 = vadd.f32 %v1417_v32, %v1637_v34  ;;  %v1453_v37 = vpop.f32.mrb[16].mxu1  ;;  %v506_v38 = vpop.f32.mrb[17].mxu0 }
 0x107   : > { %1129 = vst.msk [vmem:[%s1651_s7 + $0x38] sm:$0xf] %vm1114_vm1, %v1341_v30  ;;  %v1342_v39 = vpack.c.bf16 %v969_v31, %v969_v31  ;;  %v836_v40 = vadd.f32 %v1453_v37, %v1637_v34  ;;  %v507_v41 = vadd.f32 %v1637_v34, %v506_v38  ;;  %v827_v42 = vpop.f32.mrb[17].mxu1  ;;  %v1418_v43 = vpop.f32.mrb[18].mxu0 }
 0x108   : > { %1127 = vst.msk [vmem:[%s1651_s7 + $0x30] sm:$0xf] %vm1114_vm1, %v1339_v33  ;;  %v1340_v44 = vpack.c.bf16 %v967_v35, %v967_v35  ;;  %v908_v45 = vmax.f32 %v515_v36, 0.0  ;;  %v828_v46 = vadd.f32 %v1637_v34, %v827_v42  ;;  %v518_v47 = vadd.f32 %v1418_v43, %v1637_v34  ;;  %v1454_v48 = vpop.f32.mrb[18].mxu1  ;;  %v509_v49 = vpop.f32.mrb[19].mxu0 }
 0x109   : > { %1130 = vst.msk [vmem:[%s1651_s7 + $0x3c] sm:$0xf] %vm1114_vm1, %v1342_v39  ;;  %v940_v50 = vmax.f32 %v836_v40, 0.0  ;;  %v906_v51 = vmax.f32 %v507_v41, 0.0  ;;  %v839_v52 = vadd.f32 %v1454_v48, %v1637_v34  ;;  %v510_v53 = vadd.f32 %v1637_v34, %v509_v49  ;;  %v830_v54 = vpop.f32.mrb[19].mxu1 }
 0x10a   : > { %1128 = vst.msk [vmem:[%s1651_s7 + $0x34] sm:$0xf] %vm1114_vm1, %v1340_v44  ;;  %v938_v55 = vmax.f32 %v828_v46, 0.0  ;;  %v909_v56 = vmax.f32 %v518_v47, 0.0  ;;  %v831_v57 = vadd.f32 %v1637_v34, %v830_v54 }
 0x10b   : > { %v972_v58 = vsub.f32 %v908_v45, %v940_v50  ;;  %v941_v59 = vmax.f32 %v839_v52, 0.0  ;;  %v907_v60 = vmax.f32 %v510_v53, 0.0 }
 0x10c   : > { %v970_v61 = vsub.f32 %v906_v51, %v938_v55  ;;  %v939_v62 = vmax.f32 %v831_v57, 0.0 }
 0x10d   : > { %v1345_v63 = vpack.c.bf16 %v972_v58, %v972_v58  ;;  %v973_v0 = vsub.f32 %v909_v56, %v941_v59  ;;  %v1421_v1 = vpop.f32.mrb[20].mxu0 }
 0x10e   : > { %v1343_v2 = vpack.c.bf16 %v970_v61, %v970_v61  ;;  %v971_v3 = vsub.f32 %v907_v60, %v939_v62  ;;  %v531_v4 = vadd.f32 %v1421_v1, %v1637_v34  ;;  %v1457_v5 = vpop.f32.mrb[20].mxu1  ;;  %v522_v6 = vpop.f32.mrb[21].mxu0 }
 0x10f   : > { %1133 = vst.msk [vmem:[%s1651_s7 + $0x48] sm:$0xf] %vm1114_vm1, %v1345_v63  ;;  %v1346_v7 = vpack.c.bf16 %v973_v0, %v973_v0  ;;  %v852_v8 = vadd.f32 %v1457_v5, %v1637_v34  ;;  %v523_v9 = vadd.f32 %v1637_v34, %v522_v6  ;;  %v843_v10 = vpop.f32.mrb[21].mxu1  ;;  %v1422_v11 = vpop.f32.mrb[22].mxu0 }
 0x110   : > { %1131 = vst.msk [vmem:[%s1651_s7 + $0x40] sm:$0xf] %vm1114_vm1, %v1343_v2  ;;  %v1344_v12 = vpack.c.bf16 %v971_v3, %v971_v3  ;;  %v912_v13 = vmax.f32 %v531_v4, 0.0  ;;  %v844_v14 = vadd.f32 %v1637_v34, %v843_v10  ;;  %v534_v15 = vadd.f32 %v1422_v11, %v1637_v34  ;;  %v1458_v16 = vpop.f32.mrb[22].mxu1  ;;  %v525_v17 = vpop.f32.mrb[23].mxu0 }
 0x111   : > { %1134 = vst.msk [vmem:[%s1651_s7 + $0x4c] sm:$0xf] %vm1114_vm1, %v1346_v7  ;;  %v944_v18 = vmax.f32 %v852_v8, 0.0  ;;  %v910_v19 = vmax.f32 %v523_v9, 0.0  ;;  %v855_v20 = vadd.f32 %v1458_v16, %v1637_v34  ;;  %v526_v21 = vadd.f32 %v1637_v34, %v525_v17  ;;  %v846_v22 = vpop.f32.mrb[23].mxu1 }
 0x112   : > { %1132 = vst.msk [vmem:[%s1651_s7 + $0x44] sm:$0xf] %vm1114_vm1, %v1344_v12  ;;  %v942_v23 = vmax.f32 %v844_v14, 0.0  ;;  %v913_v24 = vmax.f32 %v534_v15, 0.0  ;;  %v847_v25 = vadd.f32 %v1637_v34, %v846_v22 }
 0x113   : > { %v976_v26 = vsub.f32 %v912_v13, %v944_v18  ;;  %v945_v27 = vmax.f32 %v855_v20, 0.0  ;;  %v911_v28 = vmax.f32 %v526_v21, 0.0 }
 0x114   : > { %v974_v29 = vsub.f32 %v910_v19, %v942_v23  ;;  %v943_v30 = vmax.f32 %v847_v25, 0.0 }
 0x115   : > { %v1349_v31 = vpack.c.bf16 %v976_v26, %v976_v26  ;;  %v977_v32 = vsub.f32 %v913_v24, %v945_v27  ;;  %v1425_v33 = vpop.f32.mrb[24].mxu0 }
 0x116   : > { %v1347_v35 = vpack.c.bf16 %v974_v29, %v974_v29  ;;  %v975_v36 = vsub.f32 %v911_v28, %v943_v30  ;;  %v547_v37 = vadd.f32 %v1425_v33, %v1637_v34  ;;  %v1461_v38 = vpop.f32.mrb[24].mxu1  ;;  %v538_v39 = vpop.f32.mrb[25].mxu0 }
 0x117   : > { %1137 = vst.msk [vmem:[%s1651_s7 + $0x58] sm:$0xf] %vm1114_vm1, %v1349_v31  ;;  %v1350_v40 = vpack.c.bf16 %v977_v32, %v977_v32  ;;  %v868_v41 = vadd.f32 %v1461_v38, %v1637_v34  ;;  %v539_v42 = vadd.f32 %v1637_v34, %v538_v39  ;;  %v859_v43 = vpop.f32.mrb[25].mxu1  ;;  %v1426_v44 = vpop.f32.mrb[26].mxu0 }
 0x118   : > { %1135 = vst.msk [vmem:[%s1651_s7 + $0x50] sm:$0xf] %vm1114_vm1, %v1347_v35  ;;  %v1348_v45 = vpack.c.bf16 %v975_v36, %v975_v36  ;;  %v916_v46 = vmax.f32 %v547_v37, 0.0  ;;  %v860_v47 = vadd.f32 %v1637_v34, %v859_v43  ;;  %v550_v48 = vadd.f32 %v1426_v44, %v1637_v34  ;;  %v1462_v49 = vpop.f32.mrb[26].mxu1  ;;  %v541_v50 = vpop.f32.mrb[27].mxu0 }
 0x119   : > { %1138 = vst.msk [vmem:[%s1651_s7 + $0x5c] sm:$0xf] %vm1114_vm1, %v1350_v40  ;;  %v948_v51 = vmax.f32 %v868_v41, 0.0  ;;  %v914_v52 = vmax.f32 %v539_v42, 0.0  ;;  %v871_v53 = vadd.f32 %v1462_v49, %v1637_v34  ;;  %v542_v54 = vadd.f32 %v1637_v34, %v541_v50  ;;  %v862_v55 = vpop.f32.mrb[27].mxu1 }
 0x11a   : > { %1136 = vst.msk [vmem:[%s1651_s7 + $0x54] sm:$0xf] %vm1114_vm1, %v1348_v45  ;;  %v946_v56 = vmax.f32 %v860_v47, 0.0  ;;  %v917_v57 = vmax.f32 %v550_v48, 0.0  ;;  %v863_v58 = vadd.f32 %v1637_v34, %v862_v55 }
 0x11b   : > { %v980_v59 = vsub.f32 %v916_v46, %v948_v51  ;;  %v949_v60 = vmax.f32 %v871_v53, 0.0  ;;  %v915_v61 = vmax.f32 %v542_v54, 0.0 }
 0x11c   : > { %v978_v62 = vsub.f32 %v914_v52, %v946_v56  ;;  %v947_v63 = vmax.f32 %v863_v58, 0.0 }
 0x11d   : > { %v1353_v0 = vpack.c.bf16 %v980_v59, %v980_v59  ;;  %v981_v1 = vsub.f32 %v917_v57, %v949_v60  ;;  %v1429_v2 = vpop.f32.mrb[28].mxu0 }
 0x11e   : > { %v1351_v3 = vpack.c.bf16 %v978_v62, %v978_v62  ;;  %v979_v4 = vsub.f32 %v915_v61, %v947_v63  ;;  %v563_v5 = vadd.f32 %v1429_v2, %v1637_v34  ;;  %v1465_v6 = vpop.f32.mrb[28].mxu1  ;;  %v554_v7 = vpop.f32.mrb[29].mxu0 }
 0x11f   : > { %1141 = vst.msk [vmem:[%s1651_s7 + $0x68] sm:$0xf] %vm1114_vm1, %v1353_v0  ;;  %v1354_v8 = vpack.c.bf16 %v981_v1, %v981_v1  ;;  %v884_v9 = vadd.f32 %v1465_v6, %v1637_v34  ;;  %v555_v10 = vadd.f32 %v1637_v34, %v554_v7  ;;  %v875_v11 = vpop.f32.mrb[29].mxu1  ;;  %v1430_v12 = vpop.f32.mrb[30].mxu0 }
 0x120   : > { %1139 = vst.msk [vmem:[%s1651_s7 + $0x60] sm:$0xf] %vm1114_vm1, %v1351_v3  ;;  %v1352_v13 = vpack.c.bf16 %v979_v4, %v979_v4  ;;  %v920_v14 = vmax.f32 %v563_v5, 0.0  ;;  %v876_v15 = vadd.f32 %v1637_v34, %v875_v11  ;;  %v566_v16 = vadd.f32 %v1430_v12, %v1637_v34  ;;  %v1466_v17 = vpop.f32.mrb[30].mxu1  ;;  %v557_v18 = vpop.f32.mrb[31].mxu0 }
 0x121   : > { %1142 = vst.msk [vmem:[%s1651_s7 + $0x6c] sm:$0xf] %vm1114_vm1, %v1354_v8  ;;  %v952_v19 = vmax.f32 %v884_v9, 0.0  ;;  %v918_v20 = vmax.f32 %v555_v10, 0.0  ;;  %v887_v21 = vadd.f32 %v1466_v17, %v1637_v34  ;;  %v558_v22 = vadd.f32 %v1637_v34, %v557_v18  ;;  %v878_v23 = vpop.f32.mrb[31].mxu1 }
 0x122   : > { %1140 = vst.msk [vmem:[%s1651_s7 + $0x64] sm:$0xf] %vm1114_vm1, %v1352_v13  ;;  %v950_v24 = vmax.f32 %v876_v15, 0.0  ;;  %v921_v25 = vmax.f32 %v566_v16, 0.0  ;;  %v879_v26 = vadd.f32 %v1637_v34, %v878_v23 }
 0x123   : > { %v984_v27 = vsub.f32 %v920_v14, %v952_v19  ;;  %v953_v28 = vmax.f32 %v887_v21, 0.0  ;;  %v919_v29 = vmax.f32 %v558_v22, 0.0 }
 0x124   : > { %v982_v30 = vsub.f32 %v918_v20, %v950_v24  ;;  %v951_v31 = vmax.f32 %v879_v26, 0.0 }
 0x125   : > { %v1357_v32 = vpack.c.bf16 %v984_v27, %v984_v27  ;;  %v985_v33 = vsub.f32 %v921_v25, %v953_v28 }
 0x126   : > { %v1355_v35 = vpack.c.bf16 %v982_v30, %v982_v30  ;;  %v983_v36 = vsub.f32 %v919_v29, %v951_v31 }
 0x127   : > { %1145 = vst.msk [vmem:[%s1651_s7 + $0x78] sm:$0xf] %vm1114_vm1, %v1357_v32  ;;  %v1358_v37 = vpack.c.bf16 %v985_v33, %v985_v33 }
 0x128   : > { %1143 = vst.msk [vmem:[%s1651_s7 + $0x70] sm:$0xf] %vm1114_vm1, %v1355_v35  ;;  %v1356_v38 = vpack.c.bf16 %v983_v36, %v983_v36 }
 0x129   : > { %1146 = vst.msk [vmem:[%s1651_s7 + $0x7c] sm:$0xf] %vm1114_vm1, %v1358_v37 }
 0x12a   : > { %1144 = vst.msk [vmem:[%s1651_s7 + $0x74] sm:$0xf] %vm1114_vm1, %v1356_v38 }
 0x12b PF: > { %s14_s15 = sadd.s32 1, %s1515_s15  }
 0x12c   : > { %p11_p4 = scmp.ge.s32.totalorder %s14_s15, 4  }
 0x12e   :  { %13 = sbr.rel (!%p11_p4) target bundleno = 1 (0x1), region = 69 }

// kernel: perceptual_loss.3
= control target key start
LH: loop header
LB: loop body
LE: loop exit
PB: predicated region body
PF: predicated region fallthrough
CT: control target
= control target key end

     0   :  { %8 = vsyncpa [#allocation3], 0  ;;  %s5630_s12 = smov 0   ;;  %s6730_s0 = inlined_call_operand.vmem [shape: bf16[2,342,64], index: 0, kind: input, shape index: {}]   ;;  %s6731_s1 = inlined_call_operand.vmem [shape: bf16[576,64], index: 1, kind: input, shape index: {}]   ;;  %s6732_s2 = inlined_call_operand.vmem [shape: f32[288,1], index: 2, kind: input, shape index: {}]   ;;  %s6733_s3 = inlined_call_operand.hbm [shape: f32[1,1], index: 3, kind: output, shape index: {}]  }
   0x1 LB: > { %s5636_s13 = sadd.s32 4294967295, %s5605_s12   ;;  %p4275_p0 = scmp.ge.s32.totalorder %s5605_s12, 1  ;;  %s5605_s12 = sphi %s5630_s12, %s14_s12  }
   0x2   : > { %p133_p1 = scmp.lt.s32.totalorder %s5605_s12, 3 }
   0x4   : > { %p134_p2 = pnand %p4275_p0, %p133_p1 }
   0x5   : > { %v5457_v0 = vld [vmem:[%s6731_s1 + $0x20] sm:$0xff] (!%p134_p2)   ;;  %p152_p3 = scmp.lt.s32.totalorder (!%p134_p2), %s5636_s13, 1  ;;  %v5459_v2 = vld [vmem:[%s6731_s1 + $0x28] sm:$0xff] (!%p134_p2)   ;;  %v5461_v4 = vld [vmem:[%s6731_s1 + $0x30] sm:$0xff] (!%p134_p2)   ;;  %vm483_vm0 = vcmask (!%p134_p2), 523264   ;;  %vm2245_vm3 = vcmask (!%p134_p2), 1045504  }
   0x6   : > { %137 = sbr.rel (%p134_p2) target bundleno = 792 (0x318), region = 32  ;;  %v5458_v1 = vld [vmem:[%s6731_s1 + $0x80] sm:$0xff] (!%p134_p2)   ;;  %4740 = vmatprep.subr.bf16.mxu1 (!%p134_p2), %v5457_v0  ;;  %v5460_v3 = vld [vmem:[%s6731_s1 + $0x88] sm:$0xff] (!%p134_p2)   ;;  %v5462_v5 = vld [vmem:[%s6731_s1 + $0x90] sm:$0xff] (!%p134_p2)   ;;  %vm310_vm1 = vsmask.f32 (!%p134_p2), 7424 }
   0x7   : > { %4916 = vmatprep.subr.bf16.mxu0 (!%p134_p2), %v5458_v1  ;;  %4741 = vmatpush3.bf16.msra.mxu1 (!%p134_p2), %v5457_v0  ;;  %v5463_v6 = vld [vmem:[%s6731_s1 + $0x38] sm:$0xff] (!%p134_p2)   ;;  %vm1771_vm2 = vsmask.f32 (!%p134_p2), 6400  ;;  %v5471_v38 = vld [vmem:[%s6731_s1 + $0xa0] sm:$0xff] (!%p134_p2)   ;;  %v5477_v61 = vld [vmem:[%s6731_s1 + $0xa8] sm:$0xff] (!%p134_p2)   ;;  %vm964_vm4 = vcmask (!%p134_p2), 1046528  }
   0x8   : > { %4917 = vmatpush3.bf16.msra.mxu0 (!%p134_p2), %v5458_v1  ;;  %4742 = vmatprep.subr.bf16.mxu1 (!%p134_p2), %v5459_v2  ;;  %v5464_v7 = vld [vmem:[%s6731_s1 + $0x98] sm:$0xff] (!%p134_p2)   ;;  %v5475_v56 = vld [vmem:[%s6731_s1] sm:$0xff] (!%p134_p2)   ;;  %vm3052_vm5 = vsmask.f32 (!%p134_p2), 5376  ;;  %vm3526_vm6 = vcmask (!%p134_p2), 1044480   ;;  %p5441_p4 = scmp.eq.s32.totalorder (!%p134_p2), %s5636_s13, 0 }
   0x9   : > { %4918 = vmatprep.subr.bf16.mxu0 (!%p134_p2), %v5460_v3  ;;  %p5442_p5 = scmp.eq.s32.totalorder (!%p134_p2), %s5636_s13, 1  ;;  %s5583_s4 = scalar_lea.hbm (!%p134_p2), %s6733_s3, 16 }
   0xa   : > { %p5584_p6 = scmp.ne.s32.totalorder (!%p134_p2), %s6733_s3, %s5583_s4  ;;  %p5589_p9 = scmp.lt.u32.totalorder (!%p134_p2), %s5583_s4, %s6733_s3 }
   0xb   : > { %4743 = vmatpush3.bf16.msra.mxu1 (!%p134_p2), %v5459_v2 }
   0xc   : > { %4919 = vmatpush3.bf16.msra.mxu0 (!%p134_p2), %v5460_v3  ;;  %4744 = vmatprep.subr.bf16.mxu1 (!%p134_p2), %v5461_v4  ;;  %p5585_p7 = pnand (!%p134_p2), %p5584_p6, %p5442_p5 }
   0xd   : > { %s153_s22 = scalar_select %p152_p3, %s5636_s13, 1  ;;  %4920 = vmatprep.subr.bf16.mxu0 %v5462_v5 }
   0xe   : > { %p5586_p8 = pneg %p5585_p7 }
   0xf   : > { %s5432_s27 = smul.u32 172, %s153_s22  ;;  %4745 = vmatpush3.bf16.msra.mxu1 %v5461_v4 }
  0x10   : > { %4921 = vmatpush3.bf16.msra.mxu0 %v5462_v5  ;;  %4746 = vmatprep.subr.bf16.mxu1 %v5463_v6  ;;  %p5591_p10 = pnand %p5589_p9, %p5586_p8 }
  0x11   : > { %s5669_s7 = scalar_lea.vmem %s6730_s0, %s5432_s27  ;;  %4922 = vmatprep.subr.bf16.mxu0 %v5464_v7 }
  0x12   : > { %v164_v8 = vld [vmem:[%s5669_s7] sm:$0xf]  ;;  %v165_v9 = vld [vmem:[%s5669_s7 + $0x4] sm:$0xf]  ;;  %v5676_v11 = vld [vmem:[%s5669_s7 + $0x8] sm:$0xff]  }
  0x13   : > { %v5673_v10 = vcombine.low %v164_v8, %v165_v9  ;;  %v5679_v12 = vld [vmem:[%s5669_s7 + $0x10] sm:$0xff]   ;;  %v1293_v13 = vld [vmem:[%s5669_s7 + $0x8] sm:$0xe]  ;;  %v5683_v14 = vld [vmem:[%s5669_s7 + $0xc] sm:$0xf]  ;;  %v319_v17 = vshll.u32 %v5676_v11, 16  ;;  %4747 = vmatpush3.bf16.msra.mxu1 %v5463_v6 }
  0x14   : > { %v323_v18 = vshrl.u32 %v5676_v11, 16  ;;  %v5690_v19 = vcombine.low %v1293_v13, %v5683_v14  ;;  %v1781_v20 = vshrl.u32 %v5679_v12, 16  ;;  %v1784_v21 = vshll.u32 %v5679_v12, 16  ;;  %v5695_v24 = vld [vmem:[%s5669_s7 + $0x10] sm:$0xff]   ;;  %v5698_v25 = vld [vmem:[%s5669_s7 + $0x18] sm:$0xff]   ;;  %4923 = vmatpush3.bf16.msra.mxu0 %v5464_v7  ;;  %v5715_v46 = vld [vmem:[%s5669_s7 + $0x20] sm:$0xff]   ;;  %4784 = vmatprep.subr.bf16.mxu1 %v5475_v56 }
  0x15   : > { %v312_v15 = vshrl.u32 %v5673_v10, 16  ;;  %v314_v16 = vshll.u32 %v5673_v10, 16  ;;  %v321_v23 = vrot.slane %v319_v17, 1  ;;  %v327_v32 = vshll.u32 %v5695_v24, 16  ;;  %4960 = vmatprep.subr.bf16.mxu0 %v5471_v38  ;;  %v5711_v44 = vld [vmem:[%s5669_s7 + $0x18] sm:$0xff]   ;;  %v5722_v52 = vld [vmem:[%s5669_s7 + $0x20] sm:$0xff]  }
  0x16   : > { %v1773_v26 = vshrl.u32 %v5690_v19, 16  ;;  %v1776_v27 = vshll.u32 %v5690_v19, 16  ;;  %v1783_v28 = vrot.slane %v1781_v20, 1  ;;  %v1786_v29 = vrot.slane %v1784_v21, 2  ;;  %v5734_v60 = vld [vmem:[%s5669_s7 + $0x28] sm:$0xff]   ;;  %v5749_v8 = vld [vmem:[%s5669_s7 + $0x30] sm:$0xff]  }
  0x17   : > { %v316_v22 = vrot.slane %v314_v16, 1  ;;  %v325_v31 = vor.u32 %v323_v18, %v321_v23  ;;  %v1790_v33 = vshrl.u32 %v5698_v25, 16  ;;  %v1793_v37 = vshll.u32 %v5698_v25, 16  ;;  %v5745_v6 = vld [vmem:[%s5669_s7 + $0x28] sm:$0xff]  }
  0x18   : > { %v1775_v34 = vrot.slane %v1773_v26, 1  ;;  %v1778_v35 = vrot.slane %v1776_v27, 2  ;;  %v1787_v36 = vor.u32 %v1786_v29, %v1783_v28  ;;  %v329_v40 = vrot.slane %v327_v32, 1  ;;  %v5764_v29 = vld [vmem:[%s5669_s7 + $0x38] sm:$0xff]  }
  0x19   : > { %v317_v30 = vor.u32 %v316_v22, %v312_v15  ;;  %v1792_v41 = vrot.slane %v1790_v33, 1  ;;  %v1795_v43 = vrot.slane %v1793_v37, 2  ;;  %v331_v45 = vshrl.u32 %v5695_v24, 16  ;;  %v5753_v15 = vld [vmem:[%s5669_s7 + $0x30] sm:$0xff]  }
  0x1a   : > { %v1779_v42 = vor.u32 %v1778_v35, %v1775_v34  ;;  %v330_v47 = vsel %vm310_vm1, %v325_v31, %v329_v40  ;;  %v335_v51 = vshll.u32 %v5711_v44, 16  ;;  %v1799_v53 = vshrl.u32 %v5715_v46, 16  ;;  %v5482_v33 = vld [vmem:[%s6731_s1 + $0xb0] sm:$0xff]  }
  0x1b   : > { %v322_v39 = vsel %vm310_vm1, %v317_v30, %v321_v23  ;;  %v1796_v49 = vor.u32 %v1795_v43, %v1792_v41  ;;  %v333_v50 = vor.u32 %v331_v45, %v329_v40  ;;  %v1802_v54 = vshll.u32 %v5715_v46, 16  ;;  %v5783_v43 = vld [vmem:[%s5669_s7 + $0x40] sm:$0xff]  }
  0x1c   : > { %4748 = vmatprep.mubr.msk.bf16.mxu1 %vm483_vm0, %v322_v39  ;;  %v1788_v48 = vsel %vm1771_vm2, %v1779_v42, %v1787_v36  ;;  %v339_v55 = vshrl.u32 %v5711_v44, 16  ;;  %v337_v58 = vrot.slane %v335_v51, 1  ;;  %v343_v59 = vshll.u32 %v5722_v52, 16  ;;  %v5780_v42 = vld [vmem:[%s5669_s7 + $0x40] sm:$0xff]  }
  0x1d   : > { %4749 = vmatmul.mubr.msk.bf16.vlgmr.msra.gmra.mrb[0].mxu1 %vm483_vm0, %v330_v47  ;;  %4924 = vmatprep.mubr.msk.bf16.mxu0 %vm483_vm0, %v1788_v48  ;;  %v1797_v57 = vsel %vm1771_vm2, %v1787_v36, %v1796_v49  ;;  %v1801_v62 = vrot.slane %v1799_v53, 1  ;;  %v1804_v63 = vrot.slane %v1802_v54, 2  ;;  %v1808_v3 = vshrl.u32 %v5734_v60, 16 }
  0x1e   : > { %4925 = vmatmul.mubr.msk.bf16.vlgmr.msra.gmra.mrb[0].mxu0 %vm483_vm0, %v1797_v57  ;;  %v338_v0 = vsel %vm310_vm1, %v333_v50, %v337_v58  ;;  %v341_v1 = vor.u32 %v339_v55, %v337_v58  ;;  %v345_v2 = vrot.slane %v343_v59, 1  ;;  %4785 = vmatpush3.bf16.msra.mxu1 %v5475_v56  ;;  %v1811_v5 = vshll.u32 %v5734_v60, 16  ;;  %v5794_v58 = vld [vmem:[%s5669_s7 + $0x48] sm:$0xff]  }
  0x1f   : > { %4961 = vmatpush3.bf16.msra.mxu0 %v5471_v38  ;;  %4752 = vmatprep.mubr.msk.bf16.mxu1 %vm483_vm0, %v338_v0  ;;  %v1805_v4 = vor.u32 %v1804_v63, %v1801_v62  ;;  %v347_v7 = vshrl.u32 %v5722_v52, 16  ;;  %v1810_v13 = vrot.slane %v1808_v3, 1  ;;  %v351_v20 = vshll.u32 %v5745_v6, 16  ;;  %v5773_v38 = vld [vmem:[%s5669_s7 + $0x38] sm:$0xff]   ;;  %v5487_v59 = vld [vmem:[%s6731_s1 + $0x8] sm:$0xff]  }
  0x20   : > { %4962 = vmatprep.subr.bf16.mxu0 %v5477_v61  ;;  %v346_v9 = vsel %vm310_vm1, %v341_v1, %v345_v2  ;;  %v1813_v17 = vrot.slane %v1811_v5, 2  ;;  %v1817_v21 = vshrl.u32 %v5749_v8, 16  ;;  %v1820_v22 = vshll.u32 %v5749_v8, 16  ;;  %v5488_v63 = vld [vmem:[%s6731_s1 + $0xb8] sm:$0xff]   ;;  %4786 = vmatprep.subr.bf16.mxu1 %v5487_v59 }
  0x21   : > { %v1806_v16 = vsel %vm1771_vm2, %v1796_v49, %v1805_v4  ;;  %v349_v18 = vor.u32 %v347_v7, %v345_v2  ;;  %v355_v23 = vshrl.u32 %v5745_v6, 16  ;;  %v359_v26 = vshll.u32 %v5753_v15, 16 }
  0x22   : > { %4928 = vmatprep.mubr.msk.bf16.mxu0 %vm483_vm0, %v1806_v16  ;;  %v1814_v27 = vor.u32 %v1813_v17, %v1810_v13  ;;  %v353_v28 = vrot.slane %v351_v20, 1  ;;  %v1819_v30 = vrot.slane %v1817_v21, 1  ;;  %v1822_v31 = vrot.slane %v1820_v22, 2  ;;  %4787 = vmatpush3.bf16.msra.mxu1 %v5487_v59  ;;  %v5809_v13 = vld [vmem:[%s5669_s7 + $0x48] sm:$0xff]   ;;  %v5815_v21 = vld [vmem:[%s5669_s7 + $0x50] sm:$0xff]  }
  0x23   : > { %4963 = vmatpush3.bf16.msra.mxu0 %v5477_v61  ;;  %v361_v32 = vrot.slane %v359_v26, 1  ;;  %v1826_v37 = vshrl.u32 %v5764_v29, 16  ;;  %v1829_v40 = vshll.u32 %v5764_v29, 16  ;;  %v363_v41 = vshrl.u32 %v5753_v15, 16  ;;  %v5818_v22 = vld [vmem:[%s5669_s7 + $0x50] sm:$0xff]  }
  0x24   : > { %v1815_v34 = vsel %vm1771_vm2, %v1805_v4, %v1814_v27  ;;  %v354_v35 = vsel %vm310_vm1, %v349_v18, %v353_v28  ;;  %v357_v36 = vor.u32 %v355_v23, %v353_v28  ;;  %v1823_v39 = vor.u32 %v1822_v31, %v1819_v30  ;;  %4964 = vmatprep.subr.bf16.mxu0 %v5482_v33 }
  0x25   : > { %4753 = vmatmul.mubr.msk.bf16.gmra.mrb[4].mxu1 %vm483_vm0, %v346_v9  ;;  %v1828_v47 = vrot.slane %v1826_v37, 1  ;;  %v367_v48 = vshll.u32 %v5773_v38, 16  ;;  %v1831_v50 = vrot.slane %v1829_v40, 2  ;;  %v365_v51 = vor.u32 %v363_v41, %v361_v32 }
  0x26   : > { %4929 = vmatmul.mubr.msk.bf16.gmra.mrb[4].mxu0 %vm483_vm0, %v1815_v34  ;;  %4756 = vmatprep.mubr.msk.bf16.mxu1 %vm483_vm0, %v354_v35  ;;  %v362_v45 = vsel %vm310_vm1, %v357_v36, %v361_v32  ;;  %v1824_v49 = vsel %vm1771_vm2, %v1814_v27, %v1823_v39  ;;  %v1835_v53 = vshrl.u32 %v5780_v42, 16  ;;  %v1838_v55 = vshll.u32 %v5780_v42, 16  ;;  %v5828_v34 = vld [vmem:[%s5669_s7 + $0x58] sm:$0xff]  }
  0x27   : > { %4965 = vmatpush3.bf16.msra.mxu0 %v5482_v33  ;;  %4932 = vmatprep.mubr.msk.bf16.mxu0 %vm483_vm0, %v1824_v49  ;;  %v369_v54 = vrot.slane %v367_v48, 1  ;;  %v371_v56 = vshrl.u32 %v5773_v38, 16  ;;  %v375_v57 = vshll.u32 %v5783_v43, 16  ;;  %v1832_v61 = vor.u32 %v1831_v50, %v1828_v47  ;;  %v5831_v36 = vld [vmem:[%s5669_s7 + $0x58] sm:$0xff]   ;;  %v5837_v47 = vld [vmem:[%s5669_s7 + $0x60] sm:$0xff]  }
  0x28   : > { %v1837_v62 = vrot.slane %v1835_v53, 1  ;;  %v1840_v1 = vrot.slane %v1838_v55, 2  ;;  %v1844_v5 = vshrl.u32 %v5794_v58, 16  ;;  %v1847_v7 = vshll.u32 %v5794_v58, 16  ;;  %4966 = vmatprep.subr.bf16.mxu0 %v5488_v63 }
  0x29   : > { %v370_v0 = vsel %vm310_vm1, %v365_v51, %v369_v54  ;;  %v373_v2 = vor.u32 %v371_v56, %v369_v54  ;;  %v377_v3 = vrot.slane %v375_v57, 1  ;;  %v1833_v4 = vsel %vm1771_vm2, %v1823_v39, %v1832_v61 }
  0x2a   : > { %v1841_v9 = vor.u32 %v1840_v1, %v1837_v62  ;;  %v379_v16 = vshrl.u32 %v5783_v43, 16  ;;  %v1846_v18 = vrot.slane %v1844_v5, 1  ;;  %v1849_v20 = vrot.slane %v1847_v7, 2  ;;  %v5496_v62 = vld [vmem:[%s6731_s1 + $0xc0] sm:$0xff]  }
  0x2b   : > { %v378_v17 = vsel %vm310_vm1, %v373_v2, %v377_v3  ;;  %v383_v27 = vshll.u32 %v5809_v13, 16  ;;  %4967 = vmatpush3.bf16.msra.mxu0 %v5488_v63  ;;  %v387_v28 = vshrl.u32 %v5809_v13, 16  ;;  %v1853_v31 = vshrl.u32 %v5815_v21, 16 }
  0x2c   : > { %v1842_v23 = vsel %vm1771_vm2, %v1832_v61, %v1841_v9  ;;  %v381_v26 = vor.u32 %v379_v16, %v377_v3  ;;  %v1850_v30 = vor.u32 %v1849_v20, %v1846_v18  ;;  %v1856_v32 = vshll.u32 %v5815_v21, 16  ;;  %v5857_v3 = vld [vmem:[%s5669_s7 + $0x68] sm:$0xff]   ;;  %5004 = vmatprep.subr.bf16.mxu0 %v5496_v62  ;;  %v5869_v20 = vld [vmem:[%s5669_s7 + $0x70] sm:$0xff]  }
  0x2d   : > { %4757 = vmatmul.mubr.msk.bf16.gmra.mrb[8].mxu1 %vm483_vm0, %v362_v45  ;;  %v391_v33 = vshll.u32 %v5818_v22, 16  ;;  %v385_v35 = vrot.slane %v383_v27, 1  ;;  %v1855_v39 = vrot.slane %v1853_v31, 1  ;;  %v2233_v45 = vld [vmem:[%s5669_s7 + $0x8] sm:$0xc]  ;;  %v1862_v50 = vshrl.u32 %v5828_v34, 16 }
  0x2e   : > { %4760 = vmatprep.mubr.msk.bf16.mxu1 %vm483_vm0, %v370_v0  ;;  %4933 = vmatmul.mubr.msk.bf16.gmra.mrb[8].mxu0 %vm483_vm0, %v1833_v4  ;;  %v1851_v37 = vsel %vm1771_vm2, %v1841_v9, %v1850_v30  ;;  %v1858_v40 = vrot.slane %v1856_v32, 2  ;;  %v1865_v51 = vshll.u32 %v5828_v34, 16  ;;  %v395_v54 = vshrl.u32 %v5818_v22, 16  ;;  %v5876_v31 = vld [vmem:[%s5669_s7 + $0x78] sm:$0xff]  }
  0x2f   : > { %4936 = vmatprep.mubr.msk.bf16.mxu0 %vm483_vm0, %v1842_v23  ;;  %v393_v41 = vrot.slane %v391_v33, 1  ;;  %v386_v48 = vsel %vm310_vm1, %v381_v26, %v385_v35  ;;  %v389_v49 = vor.u32 %v387_v28, %v385_v35  ;;  %v399_v55 = vshll.u32 %v5831_v36, 16  ;;  %v5503_v35 = vld [vmem:[%s6731_s1 + $0x18] sm:$0xff]  }
  0x30   : > { %v1859_v53 = vor.u32 %v1858_v40, %v1855_v39  ;;  %v4428_v56 = vcombine.low %v2233_v45, %v5683_v14  ;;  %v1864_v59 = vrot.slane %v1862_v50, 1  ;;  %v1867_v61 = vrot.slane %v1865_v51, 2  ;;  %v5497_v14 = vld [vmem:[%s6731_s1 + $0x10] sm:$0xff]   ;;  %v5502_v50 = vld [vmem:[%s6731_s1 + $0xc8] sm:$0xff]  }
  0x31   : > { %v394_v57 = vsel %vm310_vm1, %v389_v49, %v393_v41  ;;  %v397_v0 = vor.u32 %v395_v54, %v393_v41  ;;  %v401_v1 = vrot.slane %v399_v55, 1  ;;  %v2247_v2 = vrot.slane %v5679_v12, 2  ;;  %4788 = vmatprep.subr.bf16.mxu1 %v5497_v14  ;;  %v5893_v49 = vld [vmem:[%s5669_s7 + $0x80] sm:$0xff]  }
  0x32   : > { %v1860_v63 = vsel %vm1771_vm2, %v1850_v30, %v1859_v53  ;;  %v5860_v4 = vor.u32 %v1867_v61, %v1864_v59  ;;  %v2246_v5 = vrot.slane %v4428_v56, 2  ;;  %v403_v7 = vshrl.u32 %v5831_v36, 16  ;;  %4789 = vmatpush3.bf16.msra.mxu1 %v5497_v14 }
  0x33   : > { %v407_v9 = vshll.u32 %v5837_v47, 16  ;;  %v402_v12 = vsel %vm310_vm1, %v397_v0, %v401_v1  ;;  %v411_v16 = vshrl.u32 %v5837_v47, 16  ;;  %v2249_v32 = vrot.slane %v5698_v25, 2  ;;  %4790 = vmatprep.subr.bf16.mxu1 %v5503_v35 }
  0x34   : > { %v1869_v23 = vsel %vm1771_vm2, %v1859_v53, %v5860_v4  ;;  %v405_v26 = vor.u32 %v403_v7, %v401_v1  ;;  %v2248_v27 = vsel %vm2245_vm3, %v2246_v5, %v2247_v2  ;;  %v423_v33 = vshll.u32 %v5869_v20, 16  ;;  %v5901_v53 = vld [vmem:[%s5669_s7 + $0x88] sm:$0xff]   ;;  %v5924_v5 = vld [vmem:[%s5669_s7 + $0x90] ss:$0 sps:$4 sm:$0x11]  }
  0x35   : > { %4761 = vmatmul.mubr.msk.bf16.gmra.mrb[12].mxu1 %vm483_vm0, %v378_v17  ;;  %v415_v17 = vshll.u32 %v5857_v3, 16  ;;  %v409_v18 = vrot.slane %v407_v9, 1  ;;  %v2251_v39 = vrot.slane %v5715_v46, 2  ;;  %v419_v40 = vshrl.u32 %v5857_v3, 16 }
  0x36   : > { %4764 = vmatprep.mubr.msk.bf16.mxu1 %vm483_vm0, %v386_v48  ;;  %4937 = vmatmul.mubr.msk.bf16.gmra.mrb[12].mxu0 %vm483_vm0, %v1851_v37  ;;  %v427_v45 = vshrl.u32 %v5869_v20, 16  ;;  %v431_v25 = vshll.u32 %v5876_v31, 16  ;;  %v425_v48 = vrot.slane %v423_v33, 1  ;;  %v2250_v46 = vsel %vm2245_vm3, %v2247_v2, %v2249_v32  ;;  %v5944_v33 = vld [vmem:[%s6731_s1 + $0xe0] sm:$0xff]  }
  0x37   : > { %4940 = vmatprep.mubr.msk.bf16.mxu0 %vm483_vm0, %v1860_v63  ;;  %v413_v28 = vor.u32 %v411_v16, %v409_v18  ;;  %v417_v30 = vrot.slane %v415_v17, 1  ;;  %v410_v37 = vsel %vm310_vm1, %v405_v26, %v409_v18  ;;  %4791 = vmatpush3.bf16.msra.mxu1 %v5503_v35  ;;  %v2252_v54 = vsel %vm2245_vm3, %v2249_v32, %v2251_v39  ;;  %v5512_v18 = vld [vmem:[%s6731_s1 + $0xd8] sm:$0xff]  }
  0x38   : > { %v429_v55 = vor.u32 %v427_v45, %v425_v48  ;;  %v433_v56 = vrot.slane %v431_v25, 1  ;;  %v2253_v59 = vrot.slane %v5734_v60, 2  ;;  %v2255_v61 = vrot.slane %v5749_v8, 2  ;;  %v5506_v8 = vld [vmem:[%s6731_s1 + $0xd0] sm:$0xff]  }
  0x39   : > { %v418_v41 = vsel %vm310_vm1, %v413_v28, %v417_v30  ;;  %v421_v51 = vor.u32 %v419_v40, %v417_v30  ;;  %v439_v63 = vshll.u32 %v5893_v49, 16  ;;  %v435_v1 = vshrl.u32 %v5876_v31, 16 }
  0x3a   : > { %v443_v2 = vshrl.u32 %v5893_v49, 16  ;;  %v434_v14 = vsel %vm310_vm1, %v429_v55, %v433_v56  ;;  %v447_v60 = vshll.u32 %v5901_v53, 16  ;;  %v2254_v7 = vsel %vm2245_vm3, %v2251_v39, %v2253_v59  ;;  %v5528_v55 = vld [vmem:[%s6731_s1 + $0x58] sm:$0xff]  }
  0x3b   : > { %v426_v0 = vsel %vm310_vm1, %v421_v51, %v425_v48  ;;  %v437_v9 = vor.u32 %v435_v1, %v433_v56  ;;  %v455_v28 = vshll.u32 %v5924_v5, 16  ;;  %v2259_v32 = vrot.slane %v5780_v42, 2  ;;  %v5507_v48 = vld [vmem:[%s5669_s7 + $0x60] sm:$0xff]   ;;  %v5978_v51 = vld [vmem:[%s5669_s7 + $0x70] sm:$0xff]   ;;  %v6019_v1 = vld [vmem:[%s5669_s7 + $0x88] sm:$0xff]  }
  0x3c   : > { %v449_v17 = vrot.slane %v447_v60, 1  ;;  %v2261_v40 = vrot.slane %v5794_v58, 2  ;;  %v2267_v58 = vrot.slane %v5507_v48, 2  ;;  %v2277_v60 = vrot.slane %v6019_v1, 2  ;;  %v5534_v48 = vld [vmem:[%s6731_s1 + $0xf0] sm:$0xff]  }
  0x3d   : > { %4765 = vmatmul.mubr.msk.bf16.gmra.mrb[16].mxu1 %vm483_vm0, %v394_v57  ;;  %v5907_v57 = vld [vmem:[%s6731_s1 + $0x40] sm:$0xff]  }
  0x3e   : > { %4768 = vmatprep.mubr.msk.bf16.mxu1 %vm483_vm0, %v402_v12  ;;  %4941 = vmatmul.mubr.msk.bf16.gmra.mrb[16].mxu0 %vm483_vm0, %v1869_v23  ;;  %v2256_v12 = vsel %vm2245_vm3, %v2253_v59, %v2255_v61  ;;  %v2257_v23 = vrot.slane %v5764_v29, 2  ;;  %v2262_v45 = vsel %vm2245_vm3, %v2259_v32, %v2261_v40 }
  0x3f   : > { %4968 = vmatprep.mubr.msk.bf16.mxu0 %vm483_vm0, %v2248_v27  ;;  %4828 = vmatprep.subr.bf16.mxu1 %v5907_v57  ;;  %v451_v27 = vshrl.u32 %v5901_v53, 16 }
  0x40   : > { %v2258_v29 = vsel %vm2245_vm3, %v2255_v61, %v2257_v23  ;;  %v2260_v39 = vsel %vm2245_vm3, %v2257_v23, %v2259_v32  ;;  %v6001_v61 = vld [vmem:[%s5669_s7 + $0x80] sm:$0xff]   ;;  %v6060_v32 = vld [vmem:[%s5669_s7 + $0x28] sm:$0xff]  }
  0x41   : > { %v453_v35 = vor.u32 %v451_v27, %v449_v17 }
  0x45   : > { %4769 = vmatmul.mubr.msk.bf16.gmra.mrb[20].mxu1 %vm483_vm0, %v410_v37  ;;  %v457_v37 = vrot.slane %v455_v28, 1  ;;  %v6056_v28 = vld [vmem:[%s5669_s7 + $0x20] sm:$0xff]  }
  0x46   : > { %4772 = vmatprep.mubr.msk.bf16.mxu1 %vm483_vm0, %v418_v41  ;;  %4969 = vmatmul.mubr.msk.bf16.vlgmr.msra.gmra.mrb[0].mxu0 %vm483_vm0, %v2250_v46  ;;  %v2263_v41 = vrot.slane %v5815_v21, 2  ;;  %v5515_v21 = vld [vmem:[%s6731_s1 + $0x48] sm:$0xff]  }
  0x47   : > { %5005 = vmatpush3.bf16.msra.mxu0 %v5496_v62  ;;  %4972 = vmatprep.mubr.msk.bf16.mxu0 %vm483_vm0, %v2252_v54  ;;  %v441_v62 = vrot.slane %v439_v63, 1  ;;  %v458_v42 = vsel %vm310_vm1, %v453_v35, %v457_v37  ;;  %v5971_v46 = vld [vmem:[%s5669_s7 + $0x68] sm:$0xff]   ;;  %v6006_v63 = vld [vmem:[%s6731_s1 + $0x60] sm:$0xff]   ;;  %v2717_v35 = vrot.slane %v6060_v32, 2 }
  0x48   : > { %5006 = vmatprep.subr.bf16.mxu0 %v5502_v50  ;;  %v2264_v25 = vsel %vm2245_vm3, %v2261_v40, %v2263_v41  ;;  %v2269_v54 = vrot.slane %v5971_v46, 2  ;;  %v6076_v40 = vld [vmem:[%s5669_s7 + $0x38] sm:$0xff]  }
  0x49   : > { %v445_v16 = vor.u32 %v443_v2, %v441_v62  ;;  %v442_v26 = vsel %vm310_vm1, %v437_v9, %v441_v62  ;;  %v2574_v62 = vld [vmem:[%s5669_s7 + $0x10] sm:$0xc]  ;;  %v5517_v9 = vld [vmem:[%s5669_s7 + $0x98] ss:$0 sps:$4 sm:$0x33]  }
  0x4a   : > { %v2270_v56 = vsel %vm2245_vm3, %v2267_v58, %v2269_v54 }
  0x4b   : > { %5007 = vmatpush3.bf16.msra.mxu0 %v5502_v50  ;;  %v450_v30 = vsel %vm310_vm1, %v445_v16, %v449_v17  ;;  %v2265_v50 = vrot.slane %v5828_v34, 2  ;;  %v6044_v17 = vld [vmem:[%s5669_s7 + $0x18] sm:$0xff]  }
  0x4c   : > { %5008 = vmatprep.subr.bf16.mxu0 %v5506_v8 }
  0x4d   : > { %4773 = vmatmul.mubr.msk.bf16.gmra.mrb[24].mxu1 %vm483_vm0, %v426_v0  ;;  %v2268_v34 = vsel %vm2245_vm3, %v2265_v50, %v2267_v58 }
  0x4e   : > { %4776 = vmatprep.mubr.msk.bf16.mxu1 %vm483_vm0, %v434_v14  ;;  %4973 = vmatmul.mubr.msk.bf16.gmra.mrb[4].mxu0 %vm483_vm0, %v2254_v7  ;;  %v6023_v14 = vld [vmem:[%s5669_s7 + $0x90] sm:$0xff]  }
  0x4f   : > { %4976 = vmatprep.mubr.msk.bf16.mxu0 %vm483_vm0, %v2256_v12  ;;  %5009 = vmatpush3.bf16.msra.mxu0 %v5506_v8  ;;  %v2279_v8 = vrot.slane %v6023_v14, 2  ;;  %v6031_v7 = vld [vmem:[%s5669_s7 + $0x14] sm:$0xf] }
  0x50   : > { %5010 = vmatprep.subr.bf16.mxu0 %v5512_v18  ;;  %v6041_v16 = vcombine.low %v2574_v62, %v6031_v7 }
  0x51   : > { %v2280_v12 = vsel %vm2245_vm3, %v2277_v60, %v2279_v8 }
  0x52   : > { %v2712_v23 = vrot.slane %v6041_v16, 2 }
  0x53   : > { %5011 = vmatpush3.bf16.msra.mxu0 %v5512_v18  ;;  %v2281_v18 = vrot.slane %v5517_v9, 2 }
  0x54   : > { %5048 = vmatprep.subr.bf16.mxu0 %v5944_v33 }
  0x55   : > { %4777 = vmatmul.mubr.msk.bf16.gmra.mrb[28].mxu1 %vm483_vm0, %v442_v26  ;;  %v2713_v26 = vrot.slane %v6044_v17, 2  ;;  %v2282_v27 = vsel %vm2245_vm3, %v2279_v8, %v2281_v18  ;;  %v6126_v8 = vld [vmem:[%s5669_s7 + $0x58] sm:$0xff]   ;;  %v5557_v18 = vld [vmem:[%s5669_s7 + $0x10] sm:$0xff]  }
  0x56   : > { %4780 = vmatprep.mubr.msk.bf16.mxu1 %vm483_vm0, %v450_v30  ;;  %4977 = vmatmul.mubr.msk.bf16.gmra.mrb[8].mxu0 %vm483_vm0, %v2258_v29  ;;  %v2715_v29 = vrot.slane %v6056_v28, 2  ;;  %v2729_v9 = vrot.slane %v6126_v8, 2 }
  0x57   : > { %4980 = vmatprep.mubr.msk.bf16.mxu0 %vm483_vm0, %v2260_v39  ;;  %v2714_v30 = vsel %vm2245_vm3, %v2712_v23, %v2713_v26  ;;  %v6072_v39 = vld [vmem:[%s5669_s7 + $0x30] sm:$0xff]   ;;  %v968_v23 = vrot.slane %v5557_v18, 1  ;;  %v6195_v18 = vld [vmem:[%s5669_s7 + $0x80] sm:$0xff]  }
  0x58   : > { %v2716_v37 = vsel %vm2245_vm3, %v2713_v26, %v2715_v29  ;;  %v6140_v26 = vld [vmem:[%s5669_s7 + $0x60] sm:$0xff]  }
  0x5d   : > { %4781 = vmatmul.mubr.msk.bf16.gmra.mrb[32].mxu1 %vm483_vm0, %v458_v42  ;;  %v2718_v42 = vsel %vm2245_vm3, %v2715_v29, %v2717_v35 }
  0x5e   : > { %4792 = vmatprep.mubr.msk.bf16.mxu1 %vm483_vm0, %v5673_v10  ;;  %4981 = vmatmul.mubr.msk.bf16.gmra.mrb[12].mxu0 %vm483_vm0, %v2262_v45  ;;  %v2266_v10 = vsel %vm2245_vm3, %v2263_v41, %v2265_v50  ;;  %v5527_v41 = vld [vmem:[%s6731_s1 + $0xe8] sm:$0xff]   ;;  %v2719_v45 = vrot.slane %v6072_v39, 2 }
  0x5f   : > { %4984 = vmatprep.mubr.msk.bf16.mxu0 %vm483_vm0, %v2264_v25  ;;  %v2721_v25 = vrot.slane %v6076_v40, 2 }
  0x60   : > { %v2720_v50 = vsel %vm2245_vm3, %v2717_v35, %v2719_v45  ;;  %v6145_v35 = vld [vmem:[%s5669_s7 + $0x68] sm:$0xff]  }
  0x61   : > { %v2722_v58 = vsel %vm2245_vm3, %v2719_v45, %v2721_v25  ;;  %v2733_v45 = vrot.slane %v6145_v35, 2 }
  0x65   : > { %4793 = vmatmul.mubr.msk.bf16.vlgmr.msra.gmra.mrb[0].mxu1 %vm483_vm0, %v5676_v11  ;;  %v5522_v11 = vld [vmem:[%s6731_s1 + $0x50] sm:$0xff]  }
  0x66   : > { %4796 = vmatprep.mubr.msk.bf16.mxu1 %vm483_vm0, %v5695_v24  ;;  %4829 = vmatpush3.bf16.msra.mxu1 %v5907_v57  ;;  %v2271_v24 = vrot.slane %v5978_v51, 2  ;;  %v5997_v57 = vld [vmem:[%s5669_s7 + $0x78] sm:$0xff]  }
  0x67   : > { %4830 = vmatprep.subr.bf16.mxu1 %v5515_v21  ;;  %4985 = vmatmul.mubr.msk.bf16.gmra.mrb[16].mxu0 %vm483_vm0, %v2266_v10  ;;  %v5540_v10 = vld [vmem:[%s6731_s1 + $0xf8] sm:$0xff]  }
  0x68   : > { %4988 = vmatprep.mubr.msk.bf16.mxu0 %vm483_vm0, %v2268_v34  ;;  %v2272_v59 = vsel %vm2245_vm3, %v2269_v54, %v2271_v24  ;;  %v952_v34 = vld [vmem:[%s5669_s7] sm:$0xe] }
  0x6a   : > { %4831 = vmatpush3.bf16.msra.mxu1 %v5515_v21  ;;  %v6099_v21 = vld [vmem:[%s5669_s7 + $0x48] sm:$0xff]  }
  0x6b   : > { %4832 = vmatprep.subr.bf16.mxu1 %v5522_v11  ;;  %v2725_v54 = vrot.slane %v6099_v21, 2 }
  0x6d   : > { %4797 = vmatmul.mubr.msk.bf16.gmra.mrb[4].mxu1 %vm483_vm0, %v5711_v44  ;;  %v2273_v44 = vrot.slane %v5997_v57, 2 }
  0x6e   : > { %4800 = vmatprep.mubr.msk.bf16.mxu1 %vm483_vm0, %v5722_v52  ;;  %4833 = vmatpush3.bf16.msra.mxu1 %v5522_v11  ;;  %v2275_v52 = vrot.slane %v6001_v61, 2 }
  0x6f   : > { %4834 = vmatprep.subr.bf16.mxu1 %v5528_v55  ;;  %4989 = vmatmul.mubr.msk.bf16.gmra.mrb[20].mxu0 %vm483_vm0, %v2270_v56  ;;  %v2274_v0 = vsel %vm2245_vm3, %v2271_v24, %v2273_v44  ;;  %v5555_v24 = vld [vmem:[%s5669_s7 + $0x4] sm:$0xf] }
  0x70   : > { %4992 = vmatprep.mubr.msk.bf16.mxu0 %vm483_vm0, %v2272_v59  ;;  %v2276_v2 = vsel %vm2245_vm3, %v2273_v44, %v2275_v52  ;;  %v6113_v56 = vld [vmem:[%s6731_s1 + $0x100] sm:$0xff]   ;;  %v6121_v44 = vld [vmem:[%s5669_s7 + $0x50] sm:$0xff]  }
  0x71   : > { %v2727_v62 = vrot.slane %v6121_v44, 2 }
  0x72   : > { %4835 = vmatpush3.bf16.msra.mxu1 %v5528_v55  ;;  %v4341_v55 = vcombine.low %v952_v34, %v5555_v24  ;;  %v5547_v24 = vld [vmem:[%s6731_s1 + $0x70] sm:$0xff]  }
  0x73   : > { %4872 = vmatprep.subr.bf16.mxu1 %v6006_v63 }
  0x75   : > { %4801 = vmatmul.mubr.msk.bf16.gmra.mrb[8].mxu1 %vm483_vm0, %v5745_v6 }
  0x76   : > { %4804 = vmatprep.mubr.msk.bf16.mxu1 %vm483_vm0, %v5753_v15  ;;  %v2278_v15 = vsel %vm2245_vm3, %v2275_v52, %v2277_v60 }
  0x77   : > { %4993 = vmatmul.mubr.msk.bf16.gmra.mrb[24].mxu0 %vm483_vm0, %v2274_v0  ;;  %v965_v0 = vrot.slane %v4341_v55, 1  ;;  %v3892_v55 = vld [vmem:[%s6732_s2] sm:$0xff] }
  0x78   : > { %4996 = vmatprep.mubr.msk.bf16.mxu0 %vm483_vm0, %v2276_v2  ;;  %v5556_v2 = vld [vmem:[%s5669_s7 + $0x8] sm:$0xff]  }
  0x79   : > { %v966_v60 = vrot.slane %v5556_v2, 1  ;;  %v5549_v2 = vld [vmem:[%s6731_s1 + $0x78] sm:$0xff]  }
  0x7d   : > { %4805 = vmatmul.mubr.msk.bf16.gmra.mrb[12].mxu1 %vm483_vm0, %v5773_v38 }
  0x7e   : > { %4808 = vmatprep.mubr.msk.bf16.mxu1 %vm483_vm0, %v5783_v43 }
  0x7f   : > { %4997 = vmatmul.mubr.msk.bf16.gmra.mrb[28].mxu0 %vm483_vm0, %v2278_v15  ;;  %v967_v15 = vsel %vm964_vm4, %v965_v0, %v966_v60 }
  0x80   : > { %5000 = vmatprep.mubr.msk.bf16.mxu0 %vm483_vm0, %v2280_v12  ;;  %v2728_v12 = vsel %vm2245_vm3, %v2725_v54, %v2727_v62 }
  0x85   : > { %4809 = vmatmul.mubr.msk.bf16.gmra.mrb[16].mxu1 %vm483_vm0, %v5809_v13 }
  0x86   : > { %4812 = vmatprep.mubr.msk.bf16.mxu1 %vm483_vm0, %v5818_v22 }
  0x87   : > { %5001 = vmatmul.mubr.msk.bf16.gmra.mrb[32].mxu0 %vm483_vm0, %v2282_v27  ;;  %v2730_v27 = vsel %vm2245_vm3, %v2727_v62, %v2729_v9  ;;  %v3893_v62 = vld [vmem:[%s6732_s2 + $0x8] sm:$0xff] }
  0x88   : > { %5012 = vmatprep.mubr.msk.bf16.mxu0 %vm483_vm0, %v2714_v30  ;;  %v5558_v30 = vld [vmem:[%s5669_s7 + $0x18] sm:$0xff]  }
  0x89   : > { %v970_v29 = vrot.slane %v5558_v30, 1  ;;  %v6200_v30 = vld [vmem:[%s5669_s7 + $0x88] sm:$0xff]  }
  0x8d   : > { %4813 = vmatmul.mubr.msk.bf16.gmra.mrb[20].mxu1 %vm483_vm0, %v5831_v36 }
  0x8e   : > { %4816 = vmatprep.mubr.msk.bf16.mxu1 %vm483_vm0, %v5837_v47 }
  0x8f   : > { %5013 = vmatmul.mubr.msk.bf16.vlgmr.msra.gmra.mrb[0].mxu0 %vm483_vm0, %v2716_v37  ;;  %v969_v37 = vsel %vm964_vm4, %v966_v60, %v968_v23  ;;  %v5607_v60 = vmov 0  }
  0x90   : > { %5049 = vmatpush3.bf16.msra.mxu0 %v5944_v33  ;;  %5016 = vmatprep.mubr.msk.bf16.mxu0 %vm483_vm0, %v2718_v42  ;;  %v6095_v33 = vld [vmem:[%s5669_s7 + $0x40] sm:$0xff]   ;;  %v2731_v42 = vrot.slane %v6140_v26, 2 }
  0x91   : > { %5050 = vmatprep.subr.bf16.mxu0 %v5527_v41  ;;  %v2723_v11 = vrot.slane %v6095_v33, 2  ;;  %5455 = vset.pattern.permute.xlu0 %v5607_v60 }
  0x92   : > { %v2734_v34 = vsel %vm2245_vm3, %v2731_v42, %v2733_v45  ;;  %3930 = vperm.xlu0 %5455, %v3892_v55   ;;  %5456 = vset.pattern.permute.xlu1 %v5607_v60  ;;  %v3057_v60 = vshll.u32 %v6041_v16, 16 }
  0x93   : > { %v2724_v59 = vsel %vm2245_vm3, %v2721_v25, %v2723_v11  ;;  %v2726_v52 = vsel %vm2245_vm3, %v2723_v11, %v2725_v54  ;;  %v5543_v25 = vld [vmem:[%s6731_s1 + $0x68] sm:$0xff]   ;;  %v974_v11 = vrot.slane %v5745_v6, 1  ;;  %v6167_v54 = vld [vmem:[%s5669_s7 + $0x78] sm:$0xff]   ;;  %v3894_v6 = vld [vmem:[%s6732_s2 + $0x10] sm:$0xff] }
  0x94   : > { %5051 = vmatpush3.bf16.msra.mxu0 %v5527_v41  ;;  %v971_v41 = vsel %vm964_vm4, %v968_v23, %v970_v29  ;;  %v2737_v0 = vrot.slane %v6167_v54, 2  ;;  %3940 = vperm.xlu1 %5456, %v3894_v6  }
  0x95   : > { %4817 = vmatmul.mubr.msk.bf16.gmra.mrb[24].mxu1 %vm483_vm0, %v5857_v3  ;;  %5052 = vmatprep.subr.bf16.mxu0 %v5534_v48 }
  0x96   : > { %4820 = vmatprep.mubr.msk.bf16.mxu1 %vm483_vm0, %v5869_v20  ;;  %3935 = vperm.xlu0 %5455, %v3893_v62   ;;  %v3062_v62 = vshrl.u32 %v6044_v17, 16 }
  0x97   : > { %5017 = vmatmul.mubr.msk.bf16.gmra.mrb[4].mxu0 %vm483_vm0, %v2720_v50  ;;  %v5559_v50 = vld [vmem:[%s5669_s7 + $0x20] sm:$0xff]  }
  0x98   : > { %5020 = vmatprep.mubr.msk.bf16.mxu0 %vm483_vm0, %v2722_v58  ;;  %5053 = vmatpush3.bf16.msra.mxu0 %v5534_v48  ;;  %v2732_v48 = vsel %vm2245_vm3, %v2729_v9, %v2731_v42  ;;  %v972_v58 = vrot.slane %v5559_v50, 1  ;;  %v5560_v9 = vld [vmem:[%s5669_s7 + $0x30] sm:$0xff]  }
  0x99   : > { %5054 = vmatprep.subr.bf16.mxu0 %v5540_v10  ;;  %v3898_v50 = vld [vmem:[%s6732_s2 + $0x30] sm:$0xff] }
  0x9c   : > { %5055 = vmatpush3.bf16.msra.mxu0 %v5540_v10  ;;  %v6161_v10 = vld [vmem:[%s5669_s7 + $0x70] sm:$0xff]  }
  0x9d   : > { %4821 = vmatmul.mubr.msk.bf16.gmra.mrb[28].mxu1 %vm483_vm0, %v5876_v31  ;;  %5092 = vmatprep.subr.bf16.mxu0 %v6113_v56 }
  0x9e   : > { %4824 = vmatprep.mubr.msk.bf16.mxu1 %vm483_vm0, %v5893_v49 }
  0x9f   : > { %5021 = vmatmul.mubr.msk.bf16.gmra.mrb[8].mxu0 %vm483_vm0, %v2724_v59  ;;  %v2735_v59 = vrot.slane %v6161_v10, 2 }
  0xa0   : > { %5024 = vmatprep.mubr.msk.bf16.mxu0 %vm483_vm0, %v2726_v52  ;;  %v975_v52 = vsel %vm964_vm4, %v972_v58, %v974_v11 }
  0xa1   : > { %v2738_v23 = vsel %vm2245_vm3, %v2735_v59, %v2737_v0 }
  0xa5   : > { %4825 = vmatmul.mubr.msk.bf16.gmra.mrb[32].mxu1 %vm483_vm0, %v5901_v53 }
  0xa6   : > { %4836 = vmatprep.mubr.msk.bf16.mxu1 %vm483_vm0, %v967_v15  ;;  %v2736_v15 = vsel %vm2245_vm3, %v2733_v45, %v2735_v59  ;;  %v2741_v45 = vrot.slane %v6200_v30, 2  ;;  %v3899_v59 = vld [vmem:[%s6732_s2 + $0x38] sm:$0xff] }
  0xa7   : > { %5025 = vmatmul.mubr.msk.bf16.gmra.mrb[12].mxu0 %vm483_vm0, %v2728_v12  ;;  %v976_v12 = vrot.slane %v5560_v9, 1  ;;  %v3901_v9 = vld [vmem:[%s6732_s2 + $0x48] sm:$0xff] }
  0xa8   : > { %5028 = vmatprep.mubr.msk.bf16.mxu0 %vm483_vm0, %v2730_v27  ;;  %v978_v27 = vrot.slane %v5773_v38, 1  ;;  %v2739_v38 = vrot.slane %v6195_v18, 2 }
  0xa9   : > { %v977_v42 = vsel %vm964_vm4, %v974_v11, %v976_v12  ;;  %v6231_v11 = vld [vmem:[%s5669_s7 + $0x90] sm:$0xff]  }
  0xaa   : > { %v2742_v55 = vsel %vm2245_vm3, %v2739_v38, %v2741_v45  ;;  %v2743_v6 = vrot.slane %v6231_v11, 2 }
  0xad   : > { %4837 = vmatmul.mubr.msk.bf16.vlgmr.msra.gmra.mrb[0].mxu1 %vm483_vm0, %v969_v37  ;;  %v3896_v37 = vld [vmem:[%s6732_s2 + $0x20] sm:$0xff] }
  0xae   : > { %4840 = vmatprep.mubr.msk.bf16.mxu1 %vm483_vm0, %v971_v41  ;;  %4873 = vmatpush3.bf16.msra.mxu1 %v6006_v63  ;;  %v973_v63 = vsel %vm964_vm4, %v970_v29, %v972_v58  ;;  %v3895_v29 = vld [vmem:[%s6732_s2 + $0x18] sm:$0xff]  ;;  %v979_v41 = vsel %vm964_vm4, %v976_v12, %v978_v27  ;;  %v2740_v58 = vsel %vm2245_vm3, %v2737_v0, %v2739_v38  ;;  %v3054_v0 = vshrl.u32 %v6041_v16, 16 }
  0xaf   : > { %4874 = vmatprep.subr.bf16.mxu1 %v5543_v25  ;;  %5029 = vmatmul.mubr.msk.bf16.gmra.mrb[16].mxu0 %vm483_vm0, %v2732_v48  ;;  %v3897_v48 = vld [vmem:[%s6732_s2 + $0x28] sm:$0xff]  ;;  %v984_v12 = vrot.slane %v5818_v22, 1  ;;  %v2744_v16 = vsel %vm2245_vm3, %v2741_v45, %v2743_v6  ;;  %v3059_v38 = vrot.slane %v3057_v60, 3  ;;  %v3903_v45 = vld [vmem:[%s6732_s2 + $0x58] sm:$0xff]  ;;  %v988_v60 = vrot.slane %v5837_v47, 1  ;;  %v3908_v47 = vld [vmem:[%s6732_s2 + $0x80] sm:$0xff] }
  0xb0   : > { %5032 = vmatprep.mubr.msk.bf16.mxu0 %vm483_vm0, %v2734_v34  ;;  %3945 = vperm.xlu1 %5456, %v3895_v29   ;;  %v980_v34 = vrot.slane %v5783_v43, 1  ;;  %v3900_v43 = vld [vmem:[%s6732_s2 + $0x40] sm:$0xff]  ;;  %v986_v29 = vrot.slane %v5831_v36, 1 }
  0xb1   : > { %3950 = vperm.xlu0 %5455, %v3896_v37   ;;  %v3056_v37 = vrot.slane %v3054_v0, 2  ;;  %v3904_v36 = vld [vmem:[%s6732_s2 + $0x60] sm:$0xff] }
  0xb2   : > { %4875 = vmatpush3.bf16.msra.mxu1 %v5543_v25  ;;  %v6217_v25 = vld [vmem:[%s6731_s1 + $0x80] sm:$0xff]  }
  0xb3   : > { %4876 = vmatprep.subr.bf16.mxu1 %v5547_v24 }
  0xb4   : > { %3955 = vperm.xlu1 %5456, %v3897_v48  }
  0xb5   : > { %4841 = vmatmul.mubr.msk.bf16.gmra.mrb[4].mxu1 %vm483_vm0, %v973_v63  ;;  %v6236_v63 = vld [vmem:[%s5669_s7 + $0x98] sm:$0xff]   ;;  %3960 = vperm.xlu0 %5455, %v3898_v50  }
  0xb6   : > { %4844 = vmatprep.mubr.msk.bf16.mxu1 %vm483_vm0, %v975_v52  ;;  %4877 = vmatpush3.bf16.msra.mxu1 %v5547_v24  ;;  %v982_v24 = vrot.slane %v5809_v13, 1  ;;  %v981_v13 = vsel %vm964_vm4, %v978_v27, %v980_v34  ;;  %v5545_v27 = vld [vmem:[%s5669_s7 + $0xa0] ss:$0 sps:$4 sm:$0x33]  }
  0xb7   : > { %4878 = vmatprep.subr.bf16.mxu1 %v5549_v2  ;;  %5033 = vmatmul.mubr.msk.bf16.gmra.mrb[20].mxu0 %vm483_vm0, %v2736_v15  ;;  %v3065_v15 = vshll.u32 %v6044_v17, 16  ;;  %v2747_v50 = vrot.slane %v5545_v27, 2  ;;  %v989_v27 = vsel %vm964_vm4, %v986_v29, %v988_v60 }
  0xb8   : > { %5036 = vmatprep.mubr.msk.bf16.mxu0 %vm483_vm0, %v2738_v23  ;;  %v983_v52 = vsel %vm964_vm4, %v980_v34, %v982_v24  ;;  %3965 = vperm.xlu1 %5456, %v3899_v59   ;;  %v3902_v23 = vld [vmem:[%s6732_s2 + $0x50] sm:$0xff]  ;;  %v985_v22 = vsel %vm964_vm4, %v982_v24, %v984_v12  ;;  %v3071_v34 = vshrl.u32 %v6056_v28, 16  ;;  %v3060_v59 = vor.u32 %v3059_v38, %v3056_v37 }
  0xb9   : > { %3970 = vperm.xlu0 %5455, %v3900_v43   ;;  %v3067_v48 = vrot.slane %v3065_v15, 3  ;;  %v3080_v24 = vshrl.u32 %v6060_v32, 16 }
  0xba   : > { %4879 = vmatpush3.bf16.msra.mxu1 %v5549_v2  ;;  %v2745_v2 = vrot.slane %v6236_v63, 2 }
  0xbb   : > { %5136 = vmatprep.subr.bf16.mxu1 %v6217_v25 }
  0xbc   : > { %3975 = vperm.xlu1 %5456, %v3901_v9   ;;  %v2748_v0 = vsel %vm2245_vm3, %v2745_v2, %v2747_v50  ;;  %v992_v50 = vrot.slane %v5869_v20, 1  ;;  %v3911_v20 = vld [vmem:[%s6732_s2 + $0x98] sm:$0xff] }
  0xbd   : > { %4845 = vmatmul.mubr.msk.bf16.gmra.mrb[8].mxu1 %vm483_vm0, %v977_v42  ;;  %v2746_v42 = vsel %vm2245_vm3, %v2743_v6, %v2745_v2  ;;  %3980 = vperm.xlu0 %5455, %v3902_v23   ;;  %v3905_v6 = vld [vmem:[%s6732_s2 + $0x68] sm:$0xff]  ;;  %v3082_v23 = vrot.slane %v3080_v24, 2  ;;  %v3907_v2 = vld [vmem:[%s6732_s2 + $0x78] sm:$0xff] }
  0xbe   : > { %4848 = vmatprep.mubr.msk.bf16.mxu1 %vm483_vm0, %v979_v41  ;;  %v3064_v41 = vrot.slane %v3062_v62, 2  ;;  %v3073_v62 = vrot.slane %v3071_v34, 2 }
  0xbf   : > { %5037 = vmatmul.mubr.msk.bf16.gmra.mrb[24].mxu0 %vm483_vm0, %v2740_v58  ;;  %v987_v58 = vsel %vm964_vm4, %v984_v12, %v986_v29  ;;  %v990_v12 = vrot.slane %v5857_v3, 1  ;;  %v3089_v3 = vshrl.u32 %v6072_v39, 16  ;;  %v3910_v29 = vld [vmem:[%s6732_s2 + $0x90] sm:$0xff] }
  0xc0   : > { %5040 = vmatprep.mubr.msk.bf16.mxu0 %vm483_vm0, %v2742_v55  ;;  %v3074_v55 = vshll.u32 %v6056_v28, 16  ;;  %v3068_v43 = vor.u32 %v3067_v48, %v3064_v41  ;;  %3985 = vperm.xlu1 %5456, %v3903_v45   ;;  %v3098_v48 = vshrl.u32 %v6076_v40, 16  ;;  %v3909_v45 = vld [vmem:[%s6732_s2 + $0x88] sm:$0xff] }
  0xc1   : > { %3990 = vperm.xlu0 %5455, %v3904_v36   ;;  %v991_v38 = vsel %vm964_vm4, %v988_v60, %v990_v12  ;;  %v3110_v60 = vshll.u32 %v6095_v33, 16 }
  0xc2   : > { %v3076_v15 = vrot.slane %v3074_v55, 3  ;;  %v3069_v9 = vsel %vm3052_vm5, %v3060_v59, %v3068_v43  ;;  %v994_v59 = vrot.slane %v5876_v31, 1  ;;  %v3100_v24 = vrot.slane %v3098_v48, 2 }
  0xc3   : > { %v993_v31 = vsel %vm964_vm4, %v990_v12, %v992_v50  ;;  %v3913_v12 = vld [vmem:[%s6732_s2 + $0xa8] sm:$0xff] }
  0xc4   : > { %3995 = vperm.xlu1 %5456, %v3905_v6   ;;  %v3077_v37 = vor.u32 %v3076_v15, %v3073_v62  ;;  %v5548_v6 = vld [vmem:[%s6731_s1 + $0x108] sm:$0xff]   ;;  %v995_v62 = vsel %vm964_vm4, %v992_v50, %v994_v59 }
  0xc5   : > { %4849 = vmatmul.mubr.msk.bf16.gmra.mrb[12].mxu1 %vm483_vm0, %v981_v13  ;;  %v3083_v13 = vshll.u32 %v6060_v32, 16 }
  0xc6   : > { %4852 = vmatprep.mubr.msk.bf16.mxu1 %vm483_vm0, %v983_v52  ;;  %v3906_v52 = vld [vmem:[%s6732_s2 + $0x70] sm:$0xff]  ;;  %v3078_v36 = vsel %vm3052_vm5, %v3068_v43, %v3077_v37  ;;  %v3912_v43 = vld [vmem:[%s6732_s2 + $0xa0] sm:$0xff] }
  0xc7   : > { %5041 = vmatmul.mubr.msk.bf16.gmra.mrb[28].mxu0 %vm483_vm0, %v2744_v16  ;;  %v3085_v16 = vrot.slane %v3083_v13, 3  ;;  %4000 = vperm.xlu0 %5455, %v3906_v52  }
  0xc8   : > { %5044 = vmatprep.mubr.msk.bf16.mxu0 %vm483_vm0, %v2746_v42  ;;  %v3092_v42 = vshll.u32 %v6072_v39, 16  ;;  %4005 = vperm.xlu1 %5456, %v3907_v2  }
  0xc9   : > { %v3086_v41 = vor.u32 %v3085_v16, %v3082_v23  ;;  %v3119_v23 = vshll.u32 %v6099_v21, 16  ;;  %v3914_v16 = vld [vmem:[%s6732_s2 + $0xb0] sm:$0xff] }
  0xca   : > { %v3094_v34 = vrot.slane %v3092_v42, 3  ;;  %v998_v42 = vrot.slane %v5901_v53, 1 }
  0xcb   : > { %4010 = vperm.xlu0 %5455, %v3908_v47   ;;  %v3087_v55 = vsel %vm3052_vm5, %v3077_v37, %v3086_v41  ;;  %v996_v47 = vrot.slane %v5893_v49, 1  ;;  %v3112_v37 = vrot.slane %v3110_v60, 3  ;;  %v3121_v48 = vrot.slane %v3119_v23, 3  ;;  %v3915_v49 = vld [vmem:[%s6732_s2 + $0xb8] sm:$0xff] }
  0xcc   : > { %4015 = vperm.xlu1 %5456, %v3909_v45  }
  0xcd   : > { %4853 = vmatmul.mubr.msk.bf16.gmra.mrb[16].mxu1 %vm483_vm0, %v985_v22  ;;  %v3101_v22 = vshll.u32 %v6076_v40, 16  ;;  %v997_v53 = vsel %vm964_vm4, %v994_v59, %v996_v47  ;;  %v999_v50 = vsel %vm964_vm4, %v996_v47, %v998_v42  ;;  %v3917_v59 = vld [vmem:[%s6732_s2 + $0xc8] sm:$0xff]  ;;  %v3152_v47 = vshrl.u32 %v6145_v35, 16 }
  0xce   : > { %4856 = vmatprep.mubr.msk.bf16.mxu1 %vm483_vm0, %v987_v58  ;;  %v3091_v58 = vrot.slane %v3089_v3, 2 }
  0xcf   : > { %5045 = vmatmul.mubr.msk.bf16.gmra.mrb[32].mxu0 %vm483_vm0, %v2748_v0  ;;  %v3103_v13 = vrot.slane %v3101_v22, 3  ;;  %4020 = vperm.xlu0 %5455, %v3910_v29   ;;  %v3107_v0 = vshrl.u32 %v6095_v33, 16  ;;  %v5551_v22 = vld [vmem:[%s6731_s1 + $0x118] sm:$0xff]   ;;  %v3125_v29 = vshrl.u32 %v6121_v44, 16 }
  0xd0   : > { %5056 = vmatprep.mubr.msk.bf16.mxu0 %vm483_vm0, %v3069_v9  ;;  %v3095_v52 = vor.u32 %v3094_v34, %v3091_v58  ;;  %v3116_v9 = vshrl.u32 %v6099_v21, 16  ;;  %4025 = vperm.xlu1 %5456, %v3911_v20   ;;  %v3134_v34 = vshrl.u32 %v6126_v8, 16 }
  0xd1   : > { %v3104_v15 = vor.u32 %v3103_v13, %v3100_v24  ;;  %v1000_v24 = vrot.slane %v5924_v5, 1  ;;  %v3918_v13 = vld [vmem:[%s6732_s2 + $0xd0] sm:$0xff]  ;;  %v3127_v20 = vrot.slane %v3125_v29, 2  ;;  %v3919_v5 = vld [vmem:[%s6732_s2 + $0xd8] sm:$0xff]  ;;  %v3154_v29 = vrot.slane %v3152_v47, 2 }
  0xd2   : > { %v3096_v2 = vsel %vm3052_vm5, %v3086_v41, %v3095_v52  ;;  %v3916_v41 = vld [vmem:[%s6732_s2 + $0xc0] sm:$0xff] }
  0xd3   : > { %4030 = vperm.xlu0 %5455, %v3912_v43   ;;  %v3105_v3 = vsel %vm3052_vm5, %v3095_v52, %v3104_v15 }
  0xd4   : > { %4035 = vperm.xlu1 %5456, %v3913_v12   ;;  %v3146_v12 = vshll.u32 %v6140_v26, 16 }
  0xd5   : > { %4857 = vmatmul.mubr.msk.bf16.gmra.mrb[20].mxu1 %vm483_vm0, %v989_v27  ;;  %v3109_v27 = vrot.slane %v3107_v0, 2  ;;  %v5562_v0 = vld [vmem:[%s5669_s7 + $0x10] sm:$0xff]  }
  0xd6   : > { %4860 = vmatprep.mubr.msk.bf16.mxu1 %vm483_vm0, %v991_v38  ;;  %v3118_v38 = vrot.slane %v3116_v9, 2  ;;  %v1432_v60 = vrot.slane %v5562_v0, 1 }
  0xd7   : > { %5057 = vmatmul.mubr.msk.bf16.vlgmr.msra.gmra.mrb[0].mxu0 %vm483_vm0, %v3078_v36  ;;  %4040 = vperm.xlu0 %5455, %v3914_v16   ;;  %v3113_v45 = vor.u32 %v3112_v37, %v3109_v27  ;;  %v3128_v36 = vshll.u32 %v6121_v44, 16  ;;  %v3155_v27 = vshll.u32 %v6145_v35, 16  ;;  %v3921_v37 = vld [vmem:[%s6732_s2 + $0xe8] sm:$0xff] }
  0xd8   : > { %5093 = vmatpush3.bf16.msra.mxu0 %v6113_v56  ;;  %5060 = vmatprep.mubr.msk.bf16.mxu0 %vm483_vm0, %v3087_v55  ;;  %v5550_v56 = vld [vmem:[%s6731_s1 + $0x110] sm:$0xff]   ;;  %v3122_v58 = vor.u32 %v3121_v48, %v3118_v38  ;;  %v3137_v55 = vshll.u32 %v6126_v8, 16  ;;  %v5563_v38 = vld [vmem:[%s5669_s7 + $0x18] sm:$0xff]  }
  0xd9   : > { %5094 = vmatprep.subr.bf16.mxu0 %v5548_v6  ;;  %4045 = vperm.xlu1 %5456, %v3915_v49   ;;  %v3130_v43 = vrot.slane %v3128_v36, 3  ;;  %v1434_v48 = vrot.slane %v5563_v38, 1  ;;  %v3148_v49 = vrot.slane %v3146_v12, 3  ;;  %v3157_v36 = vrot.slane %v3155_v27, 3 }
  0xda   : > { %v3123_v52 = vsel %vm3052_vm5, %v3113_v45, %v3122_v58  ;;  %v3139_v9 = vrot.slane %v3137_v55, 3  ;;  %v3179_v27 = vshrl.u32 %v6195_v18, 16  ;;  %v3188_v38 = vshrl.u32 %v6200_v30, 16 }
  0xdb   : > { %4050 = vperm.xlu0 %5455, %v3916_v41   ;;  %v3131_v23 = vor.u32 %v3130_v43, %v3127_v20  ;;  %v3170_v20 = vshrl.u32 %v6167_v54, 16  ;;  %v3173_v43 = vshll.u32 %v6167_v54, 16 }
  0xdc   : > { %5095 = vmatpush3.bf16.msra.mxu0 %v5548_v6  ;;  %v3114_v6 = vsel %vm3052_vm5, %v3104_v15, %v3113_v45  ;;  %v3920_v15 = vld [vmem:[%s6732_s2 + $0xe0] sm:$0xff] }
  0xdd   : > { %4861 = vmatmul.mubr.msk.bf16.gmra.mrb[24].mxu1 %vm483_vm0, %v993_v31  ;;  %5096 = vmatprep.subr.bf16.mxu0 %v5550_v56  ;;  %v1431_v31 = vrot.slane %v5690_v19, 1  ;;  %v1001_v19 = vsel %vm964_vm4, %v998_v42, %v1000_v24  ;;  %v3132_v42 = vsel %vm3052_vm5, %v3122_v58, %v3131_v23  ;;  %v3924_v58 = vld [vmem:[%s6732_s2 + $0x100] sm:$0xff]  ;;  %v3164_v24 = vshll.u32 %v6161_v10, 16 }
  0xde   : > { %4864 = vmatprep.mubr.msk.bf16.mxu1 %vm483_vm0, %v995_v62  ;;  %v3136_v62 = vrot.slane %v3134_v34, 2  ;;  %4055 = vperm.xlu1 %5456, %v3917_v59   ;;  %v1435_v34 = vsel %vm964_vm4, %v1432_v60, %v1434_v48  ;;  %v3161_v59 = vshrl.u32 %v6161_v10, 16  ;;  %v3175_v12 = vrot.slane %v3173_v43, 3 }
  0xdf   : > { %5061 = vmatmul.mubr.msk.bf16.gmra.mrb[4].mxu0 %vm483_vm0, %v3096_v2  ;;  %4060 = vperm.xlu0 %5455, %v3918_v13   ;;  %v1433_v16 = vsel %vm964_vm4, %v1431_v31, %v1432_v60  ;;  %v3925_v31 = vld [vmem:[%s6732_s2 + $0x108] sm:$0xff] }
  0xe0   : > { %5064 = vmatprep.mubr.msk.bf16.mxu0 %vm483_vm0, %v3105_v3  ;;  %5097 = vmatpush3.bf16.msra.mxu0 %v5550_v56  ;;  %v3143_v56 = vshrl.u32 %v6140_v26, 16  ;;  %v3140_v2 = vor.u32 %v3139_v9, %v3136_v62  ;;  %v3922_v3 = vld [vmem:[%s6732_s2 + $0xf0] sm:$0xff]  ;;  %v5565_v60 = vld [vmem:[%s5669_s7 + $0x28] sm:$0xff]   ;;  %v3163_v9 = vrot.slane %v3161_v59, 2  ;;  %v5571_v59 = vld [vmem:[%s6731_s1 + $0x98] sm:$0xff]  }
  0xe1   : > { %5098 = vmatprep.subr.bf16.mxu0 %v5551_v22  ;;  %v1438_v62 = vrot.slane %v5565_v60, 1 }
  0xe2   : > { %4065 = vperm.xlu1 %5456, %v3919_v5   ;;  %v3141_v41 = vsel %vm3052_vm5, %v3131_v23, %v3140_v2  ;;  %v3166_v5 = vrot.slane %v3164_v24, 3 }
  0xe3   : > { %4070 = vperm.xlu0 %5455, %v3920_v15  }
  0xe4   : > { %5099 = vmatpush3.bf16.msra.mxu0 %v5551_v22  ;;  %v3145_v22 = vrot.slane %v3143_v56, 2  ;;  %v3172_v56 = vrot.slane %v3170_v20, 2  ;;  %v3167_v47 = vor.u32 %v3166_v5, %v3163_v9  ;;  %v3200_v20 = vshll.u32 %v6231_v11, 16 }
  0xe5   : > { %4865 = vmatmul.mubr.msk.bf16.gmra.mrb[28].mxu1 %vm483_vm0, %v997_v53  ;;  %v5564_v53 = vld [vmem:[%s5669_s7 + $0x20] sm:$0xff]  }
  0xe6   : > { %4868 = vmatprep.mubr.msk.bf16.mxu1 %vm483_vm0, %v999_v50  ;;  %v1436_v45 = vrot.slane %v5564_v53, 1  ;;  %4075 = vperm.xlu1 %5456, %v3921_v37   ;;  %v3923_v50 = vld [vmem:[%s6732_s2 + $0xf8] sm:$0xff]  ;;  %v3149_v55 = vor.u32 %v3148_v49, %v3145_v22  ;;  %v3182_v37 = vshll.u32 %v6195_v18, 16  ;;  %v5568_v22 = vld [vmem:[%s6731_s1 + $0x90] sm:$0xff]  }
  0xe7   : > { %5065 = vmatmul.mubr.msk.bf16.gmra.mrb[8].mxu0 %vm483_vm0, %v3114_v6  ;;  %4080 = vperm.xlu0 %5455, %v3922_v3   ;;  %v3158_v6 = vor.u32 %v3157_v36, %v3154_v29 }
  0xe8   : > { %5068 = vmatprep.mubr.msk.bf16.mxu0 %vm483_vm0, %v3123_v52  ;;  %v1437_v13 = vsel %vm964_vm4, %v1434_v48, %v1436_v45  ;;  %v3926_v52 = vld [vmem:[%s6732_s2 + $0x110] sm:$0xff]  ;;  %v3150_v0 = vsel %vm3052_vm5, %v3140_v2, %v3149_v55  ;;  %v3927_v2 = vld [vmem:[%s6732_s2 + $0x118] sm:$0xff]  ;;  %v3191_v48 = vshll.u32 %v6200_v30, 16  ;;  %v3184_v29 = vrot.slane %v3182_v37, 3 }
  0xe9   : > { %v3159_v15 = vsel %vm3052_vm5, %v3149_v55, %v3158_v6  ;;  %v3168_v49 = vsel %vm3052_vm5, %v3158_v6, %v3167_v47  ;;  %v3197_v6 = vshrl.u32 %v6231_v11, 16 }
  0xea   : > { %4085 = vperm.xlu1 %5456, %v3923_v50   ;;  %v5570_v50 = vld [vmem:[%s5669_s7 + $0x40] sm:$0xff]   ;;  %v3193_v55 = vrot.slane %v3191_v48, 3 }
  0xeb   : > { %4090 = vperm.xlu0 %5455, %v3924_v58   ;;  %v1444_v58 = vrot.slane %v5570_v50, 1  ;;  %v3199_v5 = vrot.slane %v3197_v6, 2 }
  0xed   : > { %4869 = vmatmul.mubr.msk.bf16.gmra.mrb[32].mxu1 %vm483_vm0, %v1001_v19  ;;  %v5566_v19 = vld [vmem:[%s5669_s7 + $0x30] sm:$0xff]  }
  0xee   : > { %4880 = vmatprep.mubr.msk.bf16.mxu1 %vm483_vm0, %v1433_v16  ;;  %v1440_v23 = vrot.slane %v5566_v19, 1  ;;  %v5567_v16 = vld [vmem:[%s6731_s1 + $0x88] sm:$0xff]   ;;  %4095 = vperm.xlu1 %5456, %v3925_v31   ;;  %v6474_v19 = vld [vmem:[%s5669_s7 + $0xa0] ss:$0 sps:$4 sm:$0x77]  }
  0xef   : > { %5069 = vmatmul.mubr.msk.bf16.gmra.mrb[12].mxu0 %vm483_vm0, %v3132_v42  ;;  %4100 = vperm.xlu0 %5455, %v3926_v52   ;;  %v3176_v42 = vor.u32 %v3175_v12, %v3172_v56  ;;  %v3206_v52 = vshrl.u32 %v6236_v63, 16  ;;  %v5573_v56 = vld [vmem:[%s5669_s7 + $0x50] sm:$0xff]   ;;  %v3218_v37 = vshll.u32 %v6474_v19, 16 }
  0xf0   : > { %5072 = vmatprep.mubr.msk.bf16.mxu0 %vm483_vm0, %v3141_v41  ;;  %v1441_v3 = vsel %vm964_vm4, %v1438_v62, %v1440_v23  ;;  %v5569_v41 = vld [vmem:[%s5669_s7 + $0x38] sm:$0xff]   ;;  %v1448_v12 = vrot.slane %v5573_v56, 1 }
  0xf1   : > { %v1442_v53 = vrot.slane %v5569_v41, 1  ;;  %v3177_v36 = vsel %vm3052_vm5, %v3167_v47, %v3176_v42 }
  0xf2   : > { %4105 = vperm.xlu1 %5456, %v3927_v2  }
  0xf3   : > { %v1443_v24 = vsel %vm964_vm4, %v1440_v23, %v1442_v53  ;;  %v1445_v43 = vsel %vm964_vm4, %v1442_v53, %v1444_v58  ;;  %v3220_v53 = vrot.slane %v3218_v37, 3 }
  0xf5   : > { %4881 = vmatmul.mubr.msk.bf16.vlgmr.msra.gmra.mrb[0].mxu1 %vm483_vm0, %v1435_v34  ;;  %v3190_v34 = vrot.slane %v3188_v38, 2  ;;  %v3514_v38 = vld [vmem:[%s5669_s7 + $0x10] sm:$0x8] }
  0xf6   : > { %4884 = vmatprep.mubr.msk.bf16.mxu1 %vm483_vm0, %v1437_v13  ;;  %5140 = vmatpush3.bf16.msra.mxu1 %v6217_v25  ;;  %v1439_v25 = vsel %vm964_vm4, %v1436_v45, %v1438_v62  ;;  %v3181_v45 = vrot.slane %v3179_v27, 2  ;;  %v5572_v62 = vld [vmem:[%s5669_s7 + $0x48] sm:$0xff]   ;;  %v3215_v27 = vshrl.u32 %v6474_v19, 16  ;;  %v4515_v50 = vcombine.low %v3514_v38, %v6031_v7  ;;  %v5577_v38 = vld [vmem:[%s5669_s7 + $0x70] sm:$0xff]  }
  0xf7   : > { %5137 = vmatprep.subr.bf16.mxu1 %v5567_v16  ;;  %5073 = vmatmul.mubr.msk.bf16.gmra.mrb[16].mxu0 %vm483_vm0, %v3150_v0  ;;  %v3194_v31 = vor.u32 %v3193_v55, %v3190_v34  ;;  %v3209_v0 = vshll.u32 %v6236_v63, 16  ;;  %v1446_v9 = vrot.slane %v5572_v62, 1  ;;  %v1454_v7 = vrot.slane %v5971_v46, 1 }
  0xf8   : > { %5076 = vmatprep.mubr.msk.bf16.mxu0 %vm483_vm0, %v3159_v15  ;;  %v3185_v13 = vor.u32 %v3184_v29, %v3181_v45  ;;  %v3202_v15 = vrot.slane %v3200_v20, 3  ;;  %v3217_v41 = vrot.slane %v3215_v27, 2  ;;  %v5575_v29 = vld [vmem:[%s5669_s7 + $0x60] sm:$0xff]   ;;  %v1456_v20 = vrot.slane %v5978_v51, 1  ;;  %v5576_v27 = vld [vmem:[%s5669_s7 + $0x68] sm:$0xff]  }
  0xf9   : > { %v3211_v2 = vrot.slane %v3209_v0, 3  ;;  %v1458_v51 = vrot.slane %v5997_v57, 1  ;;  %v1874_v56 = vshll.u32 %v5575_v29, 16  ;;  %v1880_v37 = vshrl.u32 %v5576_v27, 16 }
  0xfa   : > { %5141 = vmatpush3.bf16.msra.mxu1 %v5567_v16  ;;  %v3186_v60 = vsel %vm3052_vm5, %v3176_v42, %v3185_v13  ;;  %v3195_v23 = vsel %vm3052_vm5, %v3185_v13, %v3194_v31  ;;  %v3208_v16 = vrot.slane %v3206_v52, 2  ;;  %v3203_v47 = vor.u32 %v3202_v15, %v3199_v5 }
  0xfb   : > { %5138 = vmatprep.subr.bf16.mxu1 %v5568_v22  ;;  %v3221_v34 = vor.u32 %v3220_v53, %v3217_v41  ;;  %v3532_v52 = vrot.slane %v6060_v32, 3  ;;  %v3534_v32 = vrot.slane %v6072_v39, 3  ;;  %v1464_v15 = vrot.slane %v6023_v14, 1 }
  0xfc   : > { %v3212_v42 = vor.u32 %v3211_v2, %v3208_v16  ;;  %v3204_v48 = vsel %vm3052_vm5, %v3194_v31, %v3203_v47  ;;  %v1457_v31 = vsel %vm964_vm4, %v1454_v7, %v1456_v20  ;;  %v1882_v41 = vrot.slane %v1880_v37, 1 }
  0xfd   : > { %4885 = vmatmul.mubr.msk.bf16.gmra.mrb[4].mxu1 %vm483_vm0, %v1439_v25  ;;  %v1447_v25 = vsel %vm964_vm4, %v1444_v58, %v1446_v9  ;;  %v3535_v57 = vsel %vm3526_vm6, %v3532_v52, %v3534_v32  ;;  %v3554_v37 = vrot.slane %v6195_v18, 3 }
  0xfe   : > { %4888 = vmatprep.mubr.msk.bf16.mxu1 %vm483_vm0, %v1441_v3  ;;  %5142 = vmatpush3.bf16.msra.mxu1 %v5568_v22  ;;  %v1449_v3 = vsel %vm964_vm4, %v1446_v9, %v1448_v12  ;;  %v5574_v22 = vld [vmem:[%s5669_s7 + $0x58] sm:$0xff]   ;;  %v3213_v45 = vsel %vm3052_vm5, %v3203_v47, %v3212_v42  ;;  %v3222_v13 = vsel %vm3052_vm5, %v3212_v42, %v3221_v34  ;;  %v3536_v9 = vrot.slane %v6076_v40, 3 }
  0xff   : > { %5139 = vmatprep.subr.bf16.mxu1 %v5571_v59  ;;  %5077 = vmatmul.mubr.msk.bf16.gmra.mrb[20].mxu0 %vm483_vm0, %v3168_v49  ;;  %v1450_v49 = vrot.slane %v5574_v22, 1  ;;  %v3538_v40 = vrot.slane %v6095_v33, 3  ;;  %v1892_v22 = vshll.u32 %v5577_v38, 16 }
 0x100   : > { %5080 = vmatprep.mubr.msk.bf16.mxu0 %vm483_vm0, %v3177_v36  ;;  %v1452_v36 = vrot.slane %v5575_v29, 1  ;;  %v3537_v5 = vsel %vm3526_vm6, %v3534_v32, %v3536_v9 }
 0x101   : > { %v1451_v58 = vsel %vm964_vm4, %v1448_v12, %v1450_v49  ;;  %v5554_v12 = vld [vmem:[%s5669_s7 + $0x98] ss:$0 sps:$4 sm:$0x11]   ;;  %v3539_v14 = vsel %vm3526_vm6, %v3536_v9, %v3538_v40 }
 0x102   : > { %5143 = vmatpush3.bf16.msra.mxu1 %v5571_v59  ;;  %v1453_v55 = vsel %vm964_vm4, %v1450_v49, %v1452_v36  ;;  %v3527_v59 = vrot.slane %v4515_v50, 3  ;;  %v1466_v47 = vrot.slane %v5554_v12, 1  ;;  %v3542_v49 = vrot.slane %v6121_v44, 3 }
 0x103   : > { %v1894_v50 = vrot.slane %v1892_v22, 2 }
 0x105   : > { %4889 = vmatmul.mubr.msk.bf16.gmra.mrb[8].mxu1 %vm483_vm0, %v1443_v24  ;;  %v3528_v24 = vrot.slane %v6044_v17, 3  ;;  %v3530_v17 = vrot.slane %v6056_v28, 3  ;;  %v1459_v28 = vsel %vm964_vm4, %v1456_v20, %v1458_v51  ;;  %v3546_v20 = vrot.slane %v6140_v26, 3 }
 0x106   : > { %4892 = vmatprep.mubr.msk.bf16.mxu1 %vm483_vm0, %v1445_v43  ;;  %v1455_v43 = vsel %vm964_vm4, %v1452_v36, %v1454_v7  ;;  %v5579_v7 = vld [vmem:[%s5669_s7 + $0x80] sm:$0xff]  }
 0x107   : > { %5081 = vmatmul.mubr.msk.bf16.gmra.mrb[24].mxu0 %vm483_vm0, %v3186_v60  ;;  %v3529_v6 = vsel %vm3526_vm6, %v3527_v59, %v3528_v24  ;;  %v3531_v46 = vsel %vm3526_vm6, %v3528_v24, %v3530_v17  ;;  %v3533_v0 = vsel %vm3526_vm6, %v3530_v17, %v3532_v52  ;;  %v1460_v60 = vrot.slane %v6001_v61, 1 }
 0x108   : > { %5084 = vmatprep.mubr.msk.bf16.mxu0 %vm483_vm0, %v3195_v23  ;;  %v1462_v61 = vrot.slane %v6019_v1, 1  ;;  %v1871_v23 = vshrl.u32 %v5575_v29, 16  ;;  %v3540_v1 = vrot.slane %v6099_v21, 3  ;;  %v1467_v21 = vsel %vm964_vm4, %v1464_v15, %v1466_v47 }
 0x109   : > { %v1461_v62 = vsel %vm964_vm4, %v1458_v51, %v1460_v60  ;;  %v3544_v29 = vrot.slane %v6126_v8, 3  ;;  %v3548_v52 = vrot.slane %v6145_v35, 3 }
 0x10a   : > { %v1463_v39 = vsel %vm964_vm4, %v1460_v60, %v1462_v61  ;;  %v1465_v16 = vsel %vm964_vm4, %v1462_v61, %v1464_v15  ;;  %v1873_v2 = vrot.slane %v1871_v23, 1  ;;  %v3541_v42 = vsel %vm3526_vm6, %v3538_v40, %v3540_v1 }
 0x10b   : > { %v3545_v24 = vsel %vm3526_vm6, %v3542_v49, %v3544_v29  ;;  %v3549_v26 = vsel %vm3526_vm6, %v3546_v20, %v3548_v52  ;;  %v3550_v15 = vrot.slane %v6161_v10, 3  ;;  %v3552_v40 = vrot.slane %v6167_v54, 3 }
 0x10d   : > { %4893 = vmatmul.mubr.msk.bf16.gmra.mrb[12].mxu1 %vm483_vm0, %v1447_v25  ;;  %v1876_v25 = vrot.slane %v1874_v56, 2  ;;  %v3553_v10 = vsel %vm3526_vm6, %v3550_v15, %v3552_v40 }
 0x10e   : > { %4896 = vmatprep.mubr.msk.bf16.mxu1 %vm483_vm0, %v1449_v3  ;;  %v1883_v3 = vshll.u32 %v5576_v27, 16 }
 0x10f   : > { %5085 = vmatmul.mubr.msk.bf16.gmra.mrb[28].mxu0 %vm483_vm0, %v3204_v48  ;;  %v1877_v33 = vor.u32 %v1876_v25, %v1873_v2  ;;  %v1889_v48 = vshrl.u32 %v5577_v38, 16  ;;  %v5582_v25 = vld [vmem:[%s5669_s7 + $0x98] ss:$0 sps:$4 sm:$0x33]   ;;  %v3556_v38 = vrot.slane %v6200_v30, 3 }
 0x110   : > { %5088 = vmatprep.mubr.msk.bf16.mxu0 %vm483_vm0, %v3213_v45  ;;  %v1885_v53 = vrot.slane %v1883_v3, 2  ;;  %v1937_v47 = vshll.u32 %v5582_v25, 16 }
 0x111   : > { %v1878_v45 = vsel %vm1771_vm2, %v5860_v4, %v1877_v33  ;;  %v1891_v36 = vrot.slane %v1889_v48, 1  ;;  %v1910_v4 = vshll.u32 %v5579_v7, 16  ;;  %v3555_v48 = vsel %vm3526_vm6, %v3552_v40, %v3554_v37 }
 0x112   : > { %v1886_v34 = vor.u32 %v1885_v53, %v1882_v41  ;;  %v3560_v41 = vrot.slane %v6236_v63, 3 }
 0x113   : > { %v1912_v51 = vrot.slane %v1910_v4, 2 }
 0x114   : > { %v1887_v8 = vsel %vm1771_vm2, %v1877_v33, %v1886_v34 }
 0x115   : > { %4897 = vmatmul.mubr.msk.bf16.gmra.mrb[16].mxu1 %vm483_vm0, %v1451_v58  ;;  %v3543_v58 = vsel %vm3526_vm6, %v3540_v1, %v3542_v49  ;;  %v3551_v1 = vsel %vm3526_vm6, %v3548_v52, %v3550_v15  ;;  %v3558_v49 = vrot.slane %v6231_v11, 3 }
 0x116   : > { %4900 = vmatprep.mubr.msk.bf16.mxu1 %vm483_vm0, %v1453_v55  ;;  %v5578_v55 = vld [vmem:[%s5669_s7 + $0x78] sm:$0xff]  }
 0x117   : > { %5089 = vmatmul.mubr.msk.bf16.gmra.mrb[32].mxu0 %vm483_vm0, %v3222_v13  ;;  %v1898_v59 = vshrl.u32 %v5578_v55, 16  ;;  %v1901_v44 = vshll.u32 %v5578_v55, 16  ;;  %v1895_v13 = vor.u32 %v1894_v50, %v1891_v36  ;;  %v3559_v30 = vsel %vm3526_vm6, %v3556_v38, %v3558_v49 }
 0x118   : > { %5100 = vmatprep.mubr.msk.bf16.mxu0 %vm483_vm0, %v3529_v6  ;;  %v1907_v6 = vshrl.u32 %v5579_v7, 16  ;;  %v3561_v53 = vsel %vm3526_vm6, %v3558_v49, %v3560_v41 }
 0x119   : > { %v1903_v17 = vrot.slane %v1901_v44, 2  ;;  %v3931_v44 = vpop.permute.xlu0 %3930 }
 0x11d   : > { %4901 = vmatmul.mubr.msk.bf16.gmra.mrb[20].mxu1 %vm483_vm0, %v1455_v43  ;;  %v1900_v43 = vrot.slane %v1898_v59, 1 }
 0x11e   : > { %4904 = vmatprep.mubr.msk.bf16.mxu1 %vm483_vm0, %v1457_v31  ;;  %v1896_v31 = vsel %vm1771_vm2, %v1886_v34, %v1895_v13 }
 0x11f   : > { %5101 = vmatmul.mubr.msk.bf16.vlgmr.msra.gmra.mrb[0].mxu0 %vm483_vm0, %v3531_v46  ;;  %v1909_v46 = vrot.slane %v1907_v6, 1  ;;  %v1904_v60 = vor.u32 %v1903_v17, %v1900_v43 }
 0x120   : > { %5104 = vmatprep.mubr.msk.bf16.mxu0 %vm483_vm0, %v3533_v0  ;;  %v3547_v0 = vsel %vm3526_vm6, %v3544_v29, %v3546_v20 }
 0x121   : > { %v1913_v9 = vor.u32 %v1912_v51, %v1909_v46  ;;  %v1905_v35 = vsel %vm1771_vm2, %v1895_v13, %v1904_v60 }
 0x125   : > { %4905 = vmatmul.mubr.msk.bf16.gmra.mrb[24].mxu1 %vm483_vm0, %v1459_v28  ;;  %v5580_v28 = vld [vmem:[%s5669_s7 + $0x88] sm:$0xff]  }
 0x126   : > { %4908 = vmatprep.mubr.msk.bf16.mxu1 %vm483_vm0, %v1461_v62  ;;  %v1916_v32 = vshrl.u32 %v5580_v28, 16  ;;  %v1919_v62 = vshll.u32 %v5580_v28, 16 }
 0x127   : > { %5105 = vmatmul.mubr.msk.bf16.gmra.mrb[4].mxu0 %vm483_vm0, %v3535_v57  ;;  %v5581_v57 = vld [vmem:[%s5669_s7 + $0x90] sm:$0xff]   ;;  %s5608_s7 = smov 0.0  }
 0x128   : > { %5108 = vmatprep.mubr.msk.bf16.mxu0 %vm483_vm0, %v3537_v5  ;;  %v1925_v61 = vshrl.u32 %v5581_v57, 16  ;;  %v1928_v5 = vshll.u32 %v5581_v57, 16  ;;  %v1918_v23 = vrot.slane %v1916_v32, 1  ;;  %v1921_v56 = vrot.slane %v1919_v62, 2  ;;  %5436 = sst [smem:[#allocation2]] (%p5441_p4), %s5608_s7 }
 0x129   : > { %s3855_s26 = sld [smem:[#allocation2]] }
 0x12a   : > { %v1927_v12 = vrot.slane %v1925_v61, 1  ;;  %v1922_v2 = vor.u32 %v1921_v56, %v1918_v23 }
 0x12c   : > { %v1923_v54 = vsel %vm1771_vm2, %v1913_v9, %v1922_v2 }
 0x12d   : > { %4909 = vmatmul.mubr.msk.bf16.gmra.mrb[28].mxu1 %vm483_vm0, %v1463_v39  ;;  %v1914_v39 = vsel %vm1771_vm2, %v1904_v60, %v1913_v9 }
 0x12e   : > { %4912 = vmatprep.mubr.msk.bf16.mxu1 %vm483_vm0, %v1465_v16  ;;  %v1930_v16 = vrot.slane %v1928_v5, 2 }
 0x12f   : > { %5109 = vmatmul.mubr.msk.bf16.gmra.mrb[8].mxu0 %vm483_vm0, %v3539_v14  ;;  %v1934_v14 = vshrl.u32 %v5582_v25, 16 }
 0x130   : > { %5112 = vmatprep.mubr.msk.bf16.mxu0 %vm483_vm0, %v3541_v42  ;;  %v1931_v27 = vor.u32 %v1930_v16, %v1927_v12  ;;  %v1939_v42 = vrot.slane %v1937_v47, 2 }
 0x131   : > { %v1936_v3 = vrot.slane %v1934_v14, 1 }
 0x132   : > { %v1932_v33 = vsel %vm1771_vm2, %v1922_v2, %v1931_v27 }
 0x133   : > { %v1940_v22 = vor.u32 %v1939_v42, %v1936_v3 }
 0x135   : > { %4913 = vmatmul.mubr.msk.bf16.gmra.mrb[32].mxu1 %vm483_vm0, %v1467_v21  ;;  %v3557_v21 = vsel %vm3526_vm6, %v3554_v37, %v3556_v38  ;;  %v1941_v18 = vsel %vm1771_vm2, %v1931_v27, %v1940_v22 }
 0x136   : > { %4944 = vmatprep.mubr.msk.bf16.mxu1 %vm483_vm0, %v1878_v45  ;;  %v3562_v45 = vrot.slane %v6474_v19, 3  ;;  %v3936_v19 = vpop.permute.xlu0 %3935 }
 0x137   : > { %5113 = vmatmul.mubr.msk.bf16.gmra.mrb[12].mxu0 %vm483_vm0, %v3543_v58 }
 0x138   : > { %5116 = vmatprep.mubr.msk.bf16.mxu0 %vm483_vm0, %v3545_v24  ;;  %v3563_v29 = vsel %vm3526_vm6, %v3560_v41, %v3562_v45  ;;  %v3941_v24 = vpop.permute.xlu1 %3940 }
 0x13a   : > { %v3951_v43 = vpop.permute.xlu0 %3950 }
 0x13d   : > { %4945 = vmatmul.mubr.msk.bf16.vlgmr.msra.gmra.mrb[20].mxu1 %vm483_vm0, %v1887_v8  ;;  %v3946_v8 = vpop.permute.xlu1 %3945 }
 0x13e   : > { %4948 = vmatprep.mubr.msk.bf16.mxu1 %vm483_vm0, %v1896_v31  ;;  %v3961_v51 = vpop.permute.xlu0 %3960 }
 0x13f   : > { %5117 = vmatmul.mubr.msk.bf16.gmra.mrb[16].mxu0 %vm483_vm0, %v3547_v0 }
 0x140   : > { %5120 = vmatprep.mubr.msk.bf16.mxu0 %vm483_vm0, %v3549_v26 }
 0x141   : > { %v3956_v52 = vpop.permute.xlu1 %3955 }
 0x142   : > { %v6623_v26 = vpop.permute.xlu0 %3970 }
 0x145   : > { %4949 = vmatmul.mubr.msk.bf16.gmra.mrb[24].mxu1 %vm483_vm0, %v1905_v35  ;;  %v3966_v60 = vpop.permute.xlu1 %3965 }
 0x146   : > { %4952 = vmatprep.mubr.msk.bf16.mxu1 %vm483_vm0, %v1914_v39  ;;  %v6627_v57 = vpop.permute.xlu0 %3980 }
 0x147   : > { %5121 = vmatmul.mubr.msk.bf16.gmra.mrb[20].mxu0 %vm483_vm0, %v3551_v1 }
 0x148   : > { %5124 = vmatprep.mubr.msk.bf16.mxu0 %vm483_vm0, %v3553_v10 }
 0x149   : > { %v6625_v9 = vpop.permute.xlu1 %3975 }
 0x14a   : > { %v6631_v2 = vpop.permute.xlu0 %3990 }
 0x14d   : > { %4953 = vmatmul.mubr.msk.bf16.gmra.mrb[28].mxu1 %vm483_vm0, %v1923_v54  ;;  %v6629_v5 = vpop.permute.xlu1 %3985 }
 0x14e   : > { %4956 = vmatprep.mubr.msk.bf16.mxu1 %vm483_vm0, %v1932_v33 }
 0x14f   : > { %5125 = vmatmul.mubr.msk.bf16.gmra.mrb[24].mxu0 %vm483_vm0, %v3555_v48 }
 0x150   : > { %5128 = vmatprep.mubr.msk.bf16.mxu0 %vm483_vm0, %v3557_v21 }
 0x151   : > { %v6633_v10 = vpop.permute.xlu1 %3995 }
 0x155   : > { %4957 = vmatmul.mubr.msk.bf16.gmra.mrb[32].mxu1 %vm483_vm0, %v1941_v18  ;;  %v6637_v18 = vpop.permute.xlu0 %4000 }
 0x157   : > { %5129 = vmatmul.mubr.msk.bf16.gmra.mrb[28].mxu0 %vm483_vm0, %v3559_v30 }
 0x158   : > { %5132 = vmatprep.mubr.msk.bf16.mxu0 %vm483_vm0, %v3561_v53 }
 0x15f   : > { %5133 = vmatmul.mubr.msk.bf16.gmra.mrb[32].mxu0 %vm483_vm0, %v3563_v29 }
 0x1c8   : > { %v4882_v36 = vpop.f32.mrb[0].mxu1 }
 0x1c9   : > { %v1580_v11 = vpop.f32.mrb[1].mxu1 }
 0x1ca   : > { %v4883_v50 = vpop.f32.mrb[2].mxu1 }
 0x1cb   : > { %v1583_v63 = vpop.f32.mrb[3].mxu1 }
 0x1d0   : > { %v4886_v58 = vpop.f32.mrb[4].mxu1 }
 0x1d1   : > { %v1596_v34 = vpop.f32.mrb[5].mxu1 }
 0x1d2   : > { %v4887_v55 = vpop.f32.mrb[6].mxu1 }
 0x1d3   : > { %v1599_v59 = vpop.f32.mrb[7].mxu1 }
 0x1d8   : > { %v6599_v13 = vpop.f32.mrb[8].mxu1 }
 0x1d9   : > { %v6601_v7 = vpop.f32.mrb[9].mxu1 }
 0x1da   : > { %v6603_v6 = vpop.f32.mrb[10].mxu1 }
 0x1db   : > { %v6605_v4 = vpop.f32.mrb[11].mxu1 }
 0x1e0   : > { %v6607_v20 = vpop.f32.mrb[12].mxu1 }
 0x1e1   : > { %v6609_v17 = vpop.f32.mrb[13].mxu1 }
 0x1e2   : > { %v6611_v31 = vpop.f32.mrb[14].mxu1 }
 0x1e3   : > { %v6613_v46 = vpop.f32.mrb[15].mxu1 }
 0x1e8   : > { %v6615_v0 = vpop.f32.mrb[16].mxu1 }
 0x1e9   : > { %v6617_v28 = vpop.f32.mrb[17].mxu1 }
 0x1ea   : > { %v6619_v32 = vpop.f32.mrb[18].mxu1 }
 0x1eb   : > { %v6621_v62 = vpop.f32.mrb[19].mxu1 }
 0x1f2   : > { %v5102_v61 = vpop.f32.mrb[0].mxu0 }
 0x1f3   : > { %v5144_v35 = vadd.f32 %v5102_v61, %v4882_v36  ;;  %v3676_v15 = vpop.f32.mrb[1].mxu0 }
 0x1f4   : > { %v5145_v23 = vadd.f32 %v3676_v15, %v1580_v11  ;;  %v5103_v56 = vpop.f32.mrb[2].mxu0  ;;  %v6640_v11 = vpop.permute.xlu1 %4005 }
 0x1f5   : > { %v5146_v39 = vadd.f32 %v5103_v56, %v4883_v50  ;;  %v3679_v40 = vpop.f32.mrb[3].mxu0  ;;  %v3858_v12 = vand.u32 2147483647, %v5144_v35  ;;  %v6644_v35 = vpop.permute.xlu0 %4010 }
 0x1f6   : > { %v3856_v16 = vand.u32 2147483647, %v5145_v23  ;;  %v5147_v1 = vadd.f32 %v3679_v40, %v1583_v63 }
 0x1f7   : > { %v3859_v14 = vand.u32 2147483647, %v5146_v39  ;;  %v4110_v27 = vmul.f32 %v3941_v24, %v3858_v12 }
 0x1f8   : > { %v4108_v25 = vmul.f32 %v3931_v44, %v3856_v16  ;;  %v3857_v47 = vand.u32 2147483647, %v5147_v1  ;;  %v6649_v12 = vpop.permute.xlu1 %4015 }
 0x1f9   : > { %v4111_v38 = vmul.f32 %v3946_v8, %v3859_v14  ;;  %v4147_v53 = vsel %vm483_vm0, %v4110_v27, 0.0 }
 0x1fa   : > { %v4109_v54 = vmul.f32 %v3936_v19, %v3857_v47  ;;  %v5106_v37 = vpop.f32.mrb[4].mxu0  ;;  %v4144_v33 = vsel %vm483_vm0, %v4108_v25, 0.0 }
 0x1fb   : > { %v5148_v3 = vadd.f32 %v5106_v37, %v4886_v58  ;;  %v3692_v42 = vpop.f32.mrb[5].mxu0  ;;  %v4149_v63 = vsel %vm483_vm0, %v4111_v38, 0.0  ;;  %v6656_v37 = vpop.permute.xlu0 %4020 }
 0x1fc   : > { %v4145_v48 = vsel %vm483_vm0, %v4109_v54, 0.0  ;;  %v5149_v22 = vadd.f32 %v3692_v42, %v1596_v34  ;;  %v5107_v21 = vpop.f32.mrb[6].mxu0 }
 0x1fd   : > { %v4146_v49 = vadd.f32 %v4145_v48, %v4144_v33  ;;  %v5150_v41 = vadd.f32 %v5107_v21, %v4887_v55  ;;  %v3695_v30 = vpop.f32.mrb[7].mxu0  ;;  %v3862_v45 = vand.u32 2147483647, %v5148_v3  ;;  %v6661_v48 = vpop.permute.xlu1 %4025 }
 0x1fe   : > { %v3860_v29 = vand.u32 2147483647, %v5149_v22  ;;  %v5151_v36 = vadd.f32 %v3695_v30, %v1599_v59 }
 0x1ff   : > { %v4148_v50 = vadd.f32 %v4147_v53, %v4146_v49  ;;  %v3863_v44 = vand.u32 2147483647, %v5150_v41  ;;  %v4114_v19 = vmul.f32 %v3961_v51, %v3862_v45 }
 0x200   : > { %v4112_v58 = vmul.f32 %v3951_v43, %v3860_v29  ;;  %v3861_v24 = vand.u32 2147483647, %v5151_v36 }
 0x201   : > { %v4150_v34 = vadd.f32 %v4149_v63, %v4148_v50  ;;  %v4115_v56 = vmul.f32 %v3966_v60, %v3863_v44 }
 0x202   : > { %v4151_v8 = vsel %vm483_vm0, %v4112_v58, 0.0  ;;  %v4113_v61 = vmul.f32 %v3956_v52, %v3861_v24  ;;  %v5110_v55 = vpop.f32.mrb[8].mxu0  ;;  %v4155_v52 = vsel %vm483_vm0, %v4114_v19, 0.0 }
 0x203   : > { %v4152_v15 = vadd.f32 %v4151_v8, %v4150_v34  ;;  %v5152_v23 = vadd.f32 %v5110_v55, %v6599_v13  ;;  %v3708_v59 = vpop.f32.mrb[9].mxu0  ;;  %v4157_v60 = vsel %vm483_vm0, %v4115_v56, 0.0 }
 0x204   : > { %v4153_v39 = vsel %vm483_vm0, %v4113_v61, 0.0  ;;  %v5153_v40 = vadd.f32 %v3708_v59, %v6601_v7  ;;  %v5111_v43 = vpop.f32.mrb[10].mxu0 }
 0x205   : > { %v4154_v16 = vadd.f32 %v4153_v39, %v4152_v15  ;;  %v5154_v51 = vadd.f32 %v5111_v43, %v6603_v6  ;;  %v3711_v1 = vpop.f32.mrb[11].mxu0  ;;  %v3866_v25 = vand.u32 2147483647, %v5152_v23 }
 0x206   : > { %v3864_v14 = vand.u32 2147483647, %v5153_v40  ;;  %v5155_v47 = vadd.f32 %v3711_v1, %v6605_v4 }
 0x207   : > { %v4156_v13 = vadd.f32 %v4155_v52, %v4154_v16  ;;  %v3867_v54 = vand.u32 2147483647, %v5154_v51  ;;  %v4118_v42 = vmul.f32 %v6627_v57, %v3866_v25 }
 0x208   : > { %v4116_v27 = vmul.f32 %v6623_v26, %v3864_v14  ;;  %v3865_v7 = vand.u32 2147483647, %v5155_v47 }
 0x209   : > { %v4158_v3 = vadd.f32 %v4157_v60, %v4156_v13  ;;  %v4119_v26 = vmul.f32 %v6629_v5, %v3867_v54 }
 0x20a   : > { %v4159_v6 = vsel %vm483_vm0, %v4116_v27, 0.0  ;;  %v4117_v33 = vmul.f32 %v6625_v9, %v3865_v7  ;;  %v5114_v38 = vpop.f32.mrb[12].mxu0  ;;  %v4163_v9 = vsel %vm483_vm0, %v4118_v42, 0.0 }
 0x20b   : > { %v4160_v4 = vadd.f32 %v4159_v6, %v4158_v3  ;;  %v5156_v22 = vadd.f32 %v5114_v38, %v6607_v20  ;;  %v3724_v21 = vpop.f32.mrb[13].mxu0  ;;  %v6670_v20 = vpop.permute.xlu0 %4030  ;;  %v4165_v44 = vsel %vm483_vm0, %v4119_v26, 0.0 }
 0x20c   : > { %v4161_v49 = vsel %vm483_vm0, %v4117_v33, 0.0  ;;  %v5157_v41 = vadd.f32 %v3724_v21, %v6609_v17  ;;  %v5115_v30 = vpop.f32.mrb[14].mxu0 }
 0x20d   : > { %v4162_v53 = vadd.f32 %v4161_v49, %v4160_v4  ;;  %v5158_v57 = vadd.f32 %v5115_v30, %v6611_v31  ;;  %v3727_v45 = vpop.f32.mrb[15].mxu0  ;;  %v3870_v29 = vand.u32 2147483647, %v5156_v22  ;;  %v6674_v31 = vpop.permute.xlu1 %4035 }
 0x20e   : > { %v3868_v36 = vand.u32 2147483647, %v5157_v41  ;;  %v5159_v50 = vadd.f32 %v3727_v45, %v6613_v46 }
 0x20f   : > { %v4164_v58 = vadd.f32 %v4163_v9, %v4162_v53  ;;  %v3871_v24 = vand.u32 2147483647, %v5158_v57  ;;  %v4122_v55 = vmul.f32 %v6637_v18, %v3870_v29  ;;  %v4041_v51 = vpop.permute.xlu0 %4040 }
 0x210   : > { %v4946_v63 = vpop.f32.mrb[20].mxu1  ;;  %v4120_v17 = vmul.f32 %v6631_v2, %v3868_v36  ;;  %v3869_v34 = vand.u32 2147483647, %v5159_v50 }
 0x211   : > { %v2134_v5 = vpop.f32.mrb[21].mxu1  ;;  %v4166_v8 = vadd.f32 %v4165_v44, %v4164_v58  ;;  %v4123_v2 = vmul.f32 %v6640_v11, %v3871_v24  ;;  %v4171_v25 = vsel %vm483_vm0, %v4122_v55, 0.0  ;;  %v4046_v13 = vpop.permute.xlu1 %4045 }
 0x212   : > { %v4947_v19 = vpop.f32.mrb[22].mxu1  ;;  %v4167_v46 = vsel %vm483_vm0, %v4120_v17, 0.0  ;;  %v4121_v15 = vmul.f32 %v6633_v10, %v3869_v34  ;;  %v5118_v23 = vpop.f32.mrb[16].mxu0 }
 0x213   : > { %v2137_v61 = vpop.f32.mrb[23].mxu1  ;;  %v4168_v59 = vadd.f32 %v4167_v46, %v4166_v8  ;;  %v5160_v56 = vadd.f32 %v5118_v23, %v6615_v0  ;;  %v3740_v39 = vpop.f32.mrb[17].mxu0  ;;  %v4173_v27 = vsel %vm483_vm0, %v4123_v2, 0.0 }
 0x214   : > { %v4169_v40 = vsel %vm483_vm0, %v4121_v15, 0.0  ;;  %v5161_v43 = vadd.f32 %v3740_v39, %v6617_v28  ;;  %v5119_v16 = vpop.f32.mrb[18].mxu0  ;;  %v4051_v4 = vpop.permute.xlu0 %4050 }
 0x215   : > { %v4170_v1 = vadd.f32 %v4169_v40, %v4168_v59  ;;  %v5162_v18 = vadd.f32 %v5119_v16, %v6619_v32  ;;  %v3743_v52 = vpop.f32.mrb[19].mxu0  ;;  %v3874_v10 = vand.u32 2147483647, %v5160_v56  ;;  %v4056_v53 = vpop.permute.xlu1 %4055 }
 0x216   : > { %v3872_v14 = vand.u32 2147483647, %v5161_v43  ;;  %v5163_v47 = vadd.f32 %v3743_v52, %v6621_v62 }
 0x217   : > { %v4172_v60 = vadd.f32 %v4171_v25, %v4170_v1  ;;  %v3875_v54 = vand.u32 2147483647, %v5162_v18  ;;  %v4126_v6 = vmul.f32 %v6656_v37, %v3874_v10 }
 0x218   : > { %v4950_v0 = vpop.f32.mrb[24].mxu1  ;;  %v4124_v28 = vmul.f32 %v6644_v35, %v3872_v14  ;;  %v3873_v7 = vand.u32 2147483647, %v5163_v47  ;;  %v4061_v34 = vpop.permute.xlu0 %4060 }
 0x219   : > { %v2150_v11 = vpop.f32.mrb[25].mxu1  ;;  %v4174_v42 = vadd.f32 %v4173_v27, %v4172_v60  ;;  %v4127_v49 = vmul.f32 %v6661_v48, %v3875_v54  ;;  %v4179_v37 = vsel %vm483_vm0, %v4126_v6, 0.0 }
 0x21a   : > { %v4951_v3 = vpop.f32.mrb[26].mxu1  ;;  %v4175_v33 = vsel %vm483_vm0, %v4124_v28, 0.0  ;;  %v4125_v38 = vmul.f32 %v6649_v12, %v3873_v7  ;;  %v5122_v62 = vpop.f32.mrb[20].mxu0 }
 0x21b   : > { %v2153_v32 = vpop.f32.mrb[27].mxu1  ;;  %v4176_v22 = vadd.f32 %v4175_v33, %v4174_v42  ;;  %v5164_v21 = vadd.f32 %v5122_v62, %v4946_v63  ;;  %v3756_v26 = vpop.f32.mrb[21].mxu0  ;;  %v4181_v63 = vsel %vm483_vm0, %v4127_v49, 0.0 }
 0x21c   : > { %v4177_v35 = vsel %vm483_vm0, %v4125_v38, 0.0  ;;  %v5165_v41 = vadd.f32 %v3756_v26, %v2134_v5  ;;  %v5123_v30 = vpop.f32.mrb[22].mxu0 }
 0x21d   : > { %v4178_v57 = vadd.f32 %v4177_v35, %v4176_v22  ;;  %v5166_v45 = vadd.f32 %v5123_v30, %v4947_v19  ;;  %v3759_v9 = vpop.f32.mrb[23].mxu0  ;;  %v3878_v29 = vand.u32 2147483647, %v5164_v21 }
 0x21e   : > { %v3876_v36 = vand.u32 2147483647, %v5165_v41  ;;  %v5167_v12 = vadd.f32 %v3759_v9, %v2137_v61  ;;  %v4066_v61 = vpop.permute.xlu1 %4065 }
 0x21f   : > { %v4180_v58 = vadd.f32 %v4179_v37, %v4178_v57  ;;  %v3879_v17 = vand.u32 2147483647, %v5166_v45  ;;  %v4130_v19 = vmul.f32 %v4041_v51, %v3878_v29 }
 0x220   : > { %v4954_v50 = vpop.f32.mrb[28].mxu1  ;;  %v4128_v48 = vmul.f32 %v6670_v20, %v3876_v36  ;;  %v3877_v24 = vand.u32 2147483647, %v5167_v12 }
 0x221   : > { %v2166_v44 = vpop.f32.mrb[29].mxu1  ;;  %v4182_v8 = vadd.f32 %v4181_v63, %v4180_v58  ;;  %v4131_v2 = vmul.f32 %v4046_v13, %v3879_v17  ;;  %v4187_v52 = vsel %vm483_vm0, %v4130_v19, 0.0 }
 0x222   : > { %v4955_v5 = vpop.f32.mrb[30].mxu1  ;;  %v4183_v46 = vsel %vm483_vm0, %v4128_v48, 0.0  ;;  %v4129_v15 = vmul.f32 %v6674_v31, %v3877_v24  ;;  %v5126_v23 = vpop.f32.mrb[24].mxu0 }
 0x223   : > { %v2169_v55 = vpop.f32.mrb[31].mxu1  ;;  %v4184_v59 = vadd.f32 %v4183_v46, %v4182_v8  ;;  %v5168_v56 = vadd.f32 %v5126_v23, %v4950_v0  ;;  %v3772_v39 = vpop.f32.mrb[25].mxu0  ;;  %v4189_v0 = vsel %vm483_vm0, %v4131_v2, 0.0 }
 0x224   : > { %v4185_v40 = vsel %vm483_vm0, %v4129_v15, 0.0  ;;  %v5169_v20 = vadd.f32 %v3772_v39, %v2150_v11  ;;  %v5127_v43 = vpop.f32.mrb[26].mxu0  ;;  %v4071_v31 = vpop.permute.xlu0 %4070 }
 0x225   : > { %v4186_v16 = vadd.f32 %v4185_v40, %v4184_v59  ;;  %v5170_v1 = vadd.f32 %v5127_v43, %v4951_v3  ;;  %v3775_v18 = vpop.f32.mrb[27].mxu0  ;;  %v3882_v51 = vand.u32 2147483647, %v5168_v56  ;;  %v4076_v11 = vpop.permute.xlu1 %4075 }
 0x226   : > { %v3880_v25 = vand.u32 2147483647, %v5169_v20  ;;  %v5171_v10 = vadd.f32 %v3775_v18, %v2153_v32 }
 0x227   : > { %v4188_v47 = vadd.f32 %v4187_v52, %v4186_v16  ;;  %v3883_v13 = vand.u32 2147483647, %v5170_v1  ;;  %v4134_v3 = vmul.f32 %v4061_v34, %v3882_v51 }
 0x228   : > { %v4958_v14 = vpop.f32.mrb[32].mxu1  ;;  %v4132_v27 = vmul.f32 %v4051_v4, %v3880_v25  ;;  %v3881_v28 = vand.u32 2147483647, %v5171_v10  ;;  %v4081_v4 = vpop.permute.xlu0 %4080 }
 0x229   : > { %v2182_v60 = vpop.f32.mrb[33].mxu1  ;;  %v4190_v7 = vadd.f32 %v4189_v0, %v4188_v47  ;;  %v4135_v21 = vmul.f32 %v4066_v61, %v3883_v13  ;;  %v4195_v45 = vsel %vm483_vm0, %v4134_v3, 0.0  ;;  %v4086_v36 = vpop.permute.xlu1 %4085 }
 0x22a   : > { %v4959_v54 = vpop.f32.mrb[34].mxu1  ;;  %v4191_v6 = vsel %vm483_vm0, %v4132_v27, 0.0  ;;  %v4133_v33 = vmul.f32 %v4056_v53, %v3881_v28  ;;  %v5130_v38 = vpop.f32.mrb[28].mxu0 }
 0x22b   : > { %v2185_v42 = vpop.f32.mrb[35].mxu1  ;;  %v4192_v62 = vadd.f32 %v4191_v6, %v4190_v7  ;;  %v5172_v32 = vadd.f32 %v5130_v38, %v4954_v50  ;;  %v3788_v22 = vpop.f32.mrb[29].mxu0  ;;  %v4197_v12 = vsel %vm483_vm0, %v4135_v21, 0.0 }
 0x22c   : > { %v4193_v26 = vsel %vm483_vm0, %v4133_v33, 0.0  ;;  %v5173_v49 = vadd.f32 %v3788_v22, %v2166_v44  ;;  %v5131_v35 = vpop.f32.mrb[30].mxu0 }
 0x22d   : > { %v4194_v41 = vadd.f32 %v4193_v26, %v4192_v62  ;;  %v5174_v30 = vadd.f32 %v5131_v35, %v4955_v5  ;;  %v3791_v57 = vpop.f32.mrb[31].mxu0  ;;  %v3886_v9 = vand.u32 2147483647, %v5172_v32  ;;  %v4091_v5 = vpop.permute.xlu0 %4090 }
 0x22e   : > { %v3884_v37 = vand.u32 2147483647, %v5173_v49  ;;  %v5175_v29 = vadd.f32 %v3791_v57, %v2169_v55  ;;  %v4096_v59 = vpop.permute.xlu1 %4095 }
 0x22f   : > { %v4196_v53 = vadd.f32 %v4195_v45, %v4194_v41  ;;  %v3887_v58 = vand.u32 2147483647, %v5174_v30  ;;  %v4138_v17 = vmul.f32 %v4081_v4, %v3886_v9 }
 0x230   : > { %v4136_v50 = vmul.f32 %v4071_v31, %v3884_v37  ;;  %v3885_v63 = vand.u32 2147483647, %v5175_v29 }
 0x231   : > { %v4198_v48 = vadd.f32 %v4197_v12, %v4196_v53  ;;  %v4139_v15 = vmul.f32 %v4086_v36, %v3887_v58  ;;  %v4203_v40 = vsel %vm483_vm0, %v4138_v17, 0.0  ;;  %v4101_v10 = vpop.permute.xlu0 %4100 }
 0x232   : > { %v4199_v44 = vsel %vm483_vm0, %v4136_v50, 0.0  ;;  %v4137_v24 = vmul.f32 %v4076_v11, %v3885_v63  ;;  %v5134_v34 = vpop.f32.mrb[32].mxu0  ;;  %v4106_v0 = vpop.permute.xlu1 %4105 }
 0x233   : > { %v4200_v8 = vadd.f32 %v4199_v44, %v4198_v48  ;;  %v5176_v19 = vadd.f32 %v5134_v34, %v4958_v14  ;;  %v3804_v46 = vpop.f32.mrb[33].mxu0  ;;  %v4205_v18 = vsel %vm483_vm0, %v4139_v15, 0.0 }
 0x234   : > { %v4201_v55 = vsel %vm483_vm0, %v4137_v24, 0.0  ;;  %v5177_v23 = vadd.f32 %v3804_v46, %v2182_v60  ;;  %v5135_v61 = vpop.f32.mrb[34].mxu0 }
 0x235   : > { %v4202_v56 = vadd.f32 %v4201_v55, %v4200_v8  ;;  %v5178_v39 = vadd.f32 %v5135_v61, %v4959_v54  ;;  %v3807_v2 = vpop.f32.mrb[35].mxu0  ;;  %v3890_v20 = vand.u32 2147483647, %v5176_v19 }
 0x236   : > { %v3888_v43 = vand.u32 2147483647, %v5177_v23  ;;  %v5179_v16 = vadd.f32 %v3807_v2, %v2185_v42 }
 0x237   : > { %v4204_v1 = vadd.f32 %v4203_v40, %v4202_v56  ;;  %v3891_v51 = vand.u32 2147483647, %v5178_v39  ;;  %v4142_v31 = vmul.f32 %v4101_v10, %v3890_v20 }
 0x238   : > { %v4140_v52 = vmul.f32 %v4091_v5, %v3888_v43  ;;  %v3889_v25 = vand.u32 2147483647, %v5179_v16 }
 0x239   : > { %v4206_v14 = vadd.f32 %v4205_v18, %v4204_v1  ;;  %v4143_v13 = vmul.f32 %v4106_v0, %v3891_v51  ;;  %v4211_v11 = vsel %vm483_vm0, %v4142_v31, 0.0 }
 0x23a   : > { %v4207_v47 = vsel %vm483_vm0, %v4140_v52, 0.0  ;;  %v4141_v60 = vmul.f32 %v4096_v59, %v3889_v25 }
 0x23b   : > { %v4208_v27 = vadd.f32 %v4207_v47, %v4206_v14  ;;  %v4213_v42 = vsel %vm483_vm0, %v4143_v13, 0.0 }
 0x23c   : > { %v4209_v28 = vsel %vm483_vm0, %v4141_v60, 0.0 }
 0x23d   : > { %v4210_v54 = vadd.f32 %v4209_v28, %v4208_v27 }
 0x23f   : > { %v4212_v7 = vadd.f32 %v4211_v11, %v4210_v54 }
 0x241   : > { %v4214_v3 = vadd.f32 %v4213_v42, %v4212_v7 }
 0x243   : > { %4215 = vadd.xlane.f32.xlu0 %v4214_v3 }
 0x2d0   : > { %v4216_v6 = vpop.xlane.xlu0 %4215 }
 0x2d1   : > { %v4217_v33 = vrot.slane %v4216_v6, 4 }
 0x2d3   : > { %v4218_v38 = vadd.f32 %v4217_v33, %v4216_v6 }
 0x2d5   : > { %v4219_v62 = vrot.slane %v4218_v38, 2 }
 0x2d7   : > { %v4220_v32 = vadd.f32 %v4219_v62, %v4218_v38 }
 0x2d9   : > { %v4221_v22 = vrot.slane %v4220_v32, 1 }
 0x2db   : > { %v4222_v21 = vadd.f32 %v4221_v22, %v4220_v32 }
 0x2dd   : > { %5433 = vpush %v4222_v21 }
 0x30e   : > { %s5434_s27 = spop %5433 }
 0x30f   : > { %s4224_s28 = sadd.f32 %s5434_s27, %s3855_s26 }
 0x311   : > { %4226 = sst [smem:[#allocation2]] %s4224_s28 }
 0x312   : > { %5594 = shalt.err (!%p5591_p10)
}
 0x313   : > { %s5609_s10 = smov [#allocation2]  }
 0x314   : > { %5438 = dma.smem_to_hbm (%p5442_p5), %s5609_s10, 16, %s6733_s3, [#allocation3]  }
 0x315   : > { %5600 = dma.done.wait (%p5442_p5), [#allocation3], 16  }
 0x316   : > { %5602 = vsyncadd (%p5442_p5), [#allocation3], 4294967280 }
 0x317   : > { %4240 = sfence }
 0x318 PF: > { %s14_s12 = sadd.s32 1, %s5605_s12  }
 0x319   : > { %p11_p11 = scmp.ge.s32.totalorder %s14_s12, 4  }
 0x31b   :  { %13 = sbr.rel (!%p11_p11) target bundleno = 1 (0x1), region = 65 }
 0x322   :  { %4246 = vsyncpa [#allocation3], 1 }
 0x323   :  { %4248 = vsyncpa [#allocation3 + $0x1], 1 }

</bundles_post_ra>
